<compile_context>
chip_gen: v7x
topology: tpu7x:2x2x1
jax: 0.10.0
libtpu: 0.0.40
codegen_flags: <defaults>
</compile_context>

<pallas_src>
import functools

import jax
import jax.numpy as jnp
from jax.experimental import pallas as pl
from jax.experimental.pallas import tpu as pltpu


def _crw_loss_kernel(x_ref, o_ref, a12_scr, a21t_scr, *, inv_temp, eps,
                     chain_dtype):
    # x_ref: (T, N, C) f32 in VMEM ; o_ref: (1, 1) f32 in VMEM
    # a12_scr / a21t_scr: (T-1, N, N) chain_dtype VMEM scratch
    #   a12_scr[t]  = softmax_rows(A_t / temp)        (= A12[t])
    #   a21t_scr[t] = softmax_cols(A_t / temp)        (= A21[t]^T)
    T, N, C = x_ref.shape
    n_pairs = T - 1
    n_walks = T - 2
    inv_n = 1.0 / float(N)
    n_eps = float(N) * eps
    scale = inv_temp ** 0.5          # fold 1/temperature into q (both operands)

    def _normalize(frame):
        # F.normalize over channels; rsqrt goes to the EUP.
        ssq = jnp.sum(frame * frame, axis=-1, keepdims=True)
        return frame * (jax.lax.rsqrt(jnp.maximum(ssq, 1e-24)) * scale)

    # ---- Stage 1: streamed affinity + both softmaxes, one frame pair per step.
    # One NT dot per pair (contract the channel/lane axis); A21^T comes from the
    # column softmax of the SAME affinity block, so there is no second matmul,
    # no transpose, and no q[:-1]/q[1:] copies.
    dn = (((1,), (1,)), ((), ()))

    def aff_body(t, q_prev):
        q_next = _normalize(x_ref[t + 1])
        a = jax.lax.dot_general(q_prev, q_next, dn,
                                preferred_element_type=jnp.float32)  # (N,N) = A_t/temp
        # row softmax -> A12[t]
        rmax = jnp.max(a, axis=-1, keepdims=True)
        rexp = jnp.exp(a - rmax)
        a12 = rexp * pl.reciprocal(jnp.sum(rexp, axis=-1, keepdims=True),
                                   approx=True)
        # column softmax -> A21[t]^T  (sublane reduce, XLU slot)
        cmax = jnp.max(a, axis=0, keepdims=True)
        cexp = jnp.exp(a - cmax)
        a21t = cexp * pl.reciprocal(jnp.sum(cexp, axis=0, keepdims=True),
                                    approx=True)
        a12_scr[t] = a12.astype(chain_dtype)
        a21t_scr[t] = a21t.astype(chain_dtype)
        return q_next

    jax.lax.fori_loop(0, n_pairs, aff_body, _normalize(x_ref[0]), unroll=True)

    # ---- Stage 2: palindrome walks via prefix/suffix recurrence.
    #   L_i = L_{i-1} @ A12[i]
    #   S_i = S_{i-1} @ A21T[i]            (S = R^T, R_i = A21[i] @ R_{i-1})
    #   diag(P_i)   = rowsum(L_i * S_i)
    #   rowsum(P_i) = sum_m L_i[:,m] * colsum(S_i)[m]
    #   loss_i = mean_n( log(rowsum(P_i)_n + N*eps) - log(diag(P_i)_n + eps) )
    def walk_body(i, carry):
        L, S, total = carry
        # two independent MXU pushes, kept adjacent
        L = jnp.dot(L, a12_scr[i],
                    preferred_element_type=jnp.float32).astype(chain_dtype)
        S = jnp.dot(S, a21t_scr[i],
                    preferred_element_type=jnp.float32).astype(chain_dtype)
        Lf = L.astype(jnp.float32)
        Sf = S.astype(jnp.float32)
        diag_p = jnp.sum(Lf * Sf, axis=-1, keepdims=True)       # (N, 1)
        col_s = jnp.sum(Sf, axis=0, keepdims=True)              # (1, N)
        rsum_p = jnp.sum(Lf * col_s, axis=-1, keepdims=True)    # (N, 1)
        xent = jnp.log(rsum_p + n_eps) - jnp.log(diag_p + eps)  # (N, 1)
        walk = jnp.sum(xent, axis=0, keepdims=True) * inv_n     # (1, 1)
        return L, S, total + walk

    init = (a12_scr[0], a21t_scr[0], jnp.zeros((1, 1), jnp.float32))
    _, _, total = jax.lax.fori_loop(1, n_pairs, walk_body, init, unroll=True)

    o_ref[...] = total * (1.0 / max(1, n_walks))


@functools.partial(jax.jit, static_argnames=("temperature", "chain_dtype"))
def crw_loss(x, temperature=0.07, chain_dtype=jnp.bfloat16):
    """x: (T, C, H, W) float32 (PyTorch frame layout, B=1, N_patches=1).

    chain_dtype: storage dtype of the post-softmax stochastic stacks and the
    L/S walk carries (bf16 recommended on v5e/v6e/v7x; all dots accumulate f32).
    """
    T, C, H, W = x.shape
    N = H * W
    chain_dt = jnp.dtype(chain_dtype)
    # Layout glue kept in the wrapper: (T,C,H,W) -> (T,N,C) so every in-kernel
    # matmul contracts the last (lane) axis.
    xk = jnp.transpose(x, (0, 2, 3, 1)).reshape(T, N, C).astype(jnp.float32)

    # ---- VMEM budget (with lane padding) + headroom, capped for portability.
    pad128 = lambda v: ((v + 127) // 128) * 128
    scratch_bytes = 2 * (T - 1) * N * pad128(N) * chain_dt.itemsize
    live_bytes = (T * N * pad128(C) * 4            # input
                  + 12 * N * pad128(N) * 4         # per-step temporaries
                  + (1 << 20))                     # slack
    vmem_limit = int(min(max(2 * (scratch_bytes + live_bytes), 16 * 2 ** 20),
                         100 * 2 ** 20))

    flops = int((T - 1) * 2 * N * N * C            # affinity dots
                + (T - 2) * 4 * N ** 3             # chain dots (L, S)
                + (T - 2) * 6 * N * N)             # loss reductions
    transcendentals = int(2 * (T - 1) * N * N      # softmax exps
                          + T * N                  # rsqrt
                          + 2 * (T - 1) * N        # softmax reciprocals
                          + 2 * (T - 2) * N)       # logs
    bytes_accessed = int(xk.size * 4 + 4)

    out = pl.pallas_call(
        functools.partial(_crw_loss_kernel,
                          inv_temp=1.0 / temperature, eps=1e-20,
                          chain_dtype=chain_dt),
        out_shape=jax.ShapeDtypeStruct((1, 1), jnp.float32),
        in_specs=[pl.BlockSpec(memory_space=pltpu.MemorySpace.VMEM)],
        out_specs=pl.BlockSpec(memory_space=pltpu.MemorySpace.VMEM),
        scratch_shapes=[
            pltpu.VMEM((T - 1, N, N), chain_dt),   # A12 stack
            pltpu.VMEM((T - 1, N, N), chain_dt),   # A21^T stack
        ],
        compiler_params=pltpu.CompilerParams(vmem_limit_bytes=vmem_limit),
        cost_estimate=pl.CostEstimate(flops=flops,
                                      transcendentals=transcendentals,
                                      bytes_accessed=bytes_accessed),
    )(xk)
    return out[0, 0]


def crw_loss_ref(x, temperature=0.07, eps=1e-20):
    """Pure-JAX reference of the same forward (for verification)."""
    T, C, H, W = x.shape
    N = H * W
    q = jnp.transpose(x, (0, 2, 3, 1)).reshape(T, N, C)
    q = q / jnp.maximum(jnp.linalg.norm(q, axis=-1, keepdims=True), 1e-12)
    A = jnp.einsum("tnc,tmc->tnm", q[:-1], q[1:],
                   precision=jax.lax.Precision.HIGHEST)
    a12 = jax.nn.softmax(A / temperature, axis=-1)
    a21 = jax.nn.softmax(jnp.swapaxes(A, -1, -2) / temperature, axis=-1)
    losses = []
    for i in range(1, T - 1):
        chain = [a12[j] for j in range(i + 1)] + [a21[j] for j in range(i, -1, -1)]
        P = chain[0]
        for M in chain[1:]:
            P = jnp.dot(P, M, precision=jax.lax.Precision.HIGHEST)
        logits = jnp.log(P + eps)
        lse = jax.scipy.special.logsumexp(logits, axis=-1)
        diag = logits[jnp.arange(N), jnp.arange(N)]
        losses.append(jnp.mean(lse - diag))
    return sum(losses) / max(1, T - 2)


if __name__ == "__main__":
    key = jax.random.PRNGKey(0)
    T, C, H, W = 8, 32, 4, 4          # -> N = 16 nodes per frame
    x = jax.random.normal(key, (T, C, H, W), dtype=jnp.float32)

    ref = jax.block_until_ready(crw_loss_ref(x))
    ref_f = float(ref)

    # f32 chain: tight tolerance (algebraic rewrites are exact).
    loss_f32 = jax.block_until_ready(crw_loss(x, chain_dtype=jnp.float32))
    assert abs(float(loss_f32) - ref_f) < 1e-2 * max(1.0, abs(ref_f)), (
        float(loss_f32), ref_f)

    # bf16 stochastic stacks / carries (default): looser tolerance for the
    # post-softmax bf16 storage rounding.
    loss_bf16 = jax.block_until_ready(crw_loss(x))
    assert abs(float(loss_bf16) - ref_f) < 5e-2 * max(1.0, abs(ref_f)), (
        float(loss_bf16), ref_f)

    print("KERNEL_OK")
</pallas_src>

<mosaic_0001>
module attributes {stable_mosaic.version = 11 : i64} {
  func.func @_crw_loss_kernel(%arg0: memref<8x16x32xf32, #tpu.memory_space<vmem>>, %arg1: memref<1x1xf32, #tpu.memory_space<vmem>>, %arg2: memref<7x16x16xf32, #tpu.memory_space<vmem>>, %arg3: memref<7x16x16xf32, #tpu.memory_space<vmem>>) attributes {dimension_semantics = [], scalar_prefetch = 0 : i64, scratch_operands = 2 : i64, tpu.core_type = #tpu.core_type<tc>} {
    %c0 = arith.constant 0 : index
    %c0_0 = arith.constant 0 : index
    %c0_1 = arith.constant 0 : index
    %0 = vector.load %arg0[%c0, %c0_0, %c0_1] : memref<8x16x32xf32, #tpu.memory_space<vmem>>, vector<1x16x32xf32>
    %1 = vector.shape_cast %0 : vector<1x16x32xf32> to vector<16x32xf32>
    %2 = arith.mulf %1, %1 : vector<16x32xf32>
    %cst = arith.constant dense<0.000000e+00> : vector<16xf32>
    %3 = vector.multi_reduction <add>, %2, %cst [1] : vector<16x32xf32> to vector<16xf32>
    %4 = vector.shape_cast %3 : vector<16xf32> to vector<16x1xf32>
    %cst_2 = arith.constant 1.000000e-24 : f32
    %5 = vector.broadcast %cst_2 : f32 to vector<16x1xf32>
    %6 = arith.maximumf %4, %5 : vector<16x1xf32>
    %7 = math.rsqrt %6 : vector<16x1xf32>
    %cst_3 = arith.constant 3.77964473 : f32
    %8 = vector.broadcast %cst_3 : f32 to vector<16x1xf32>
    %9 = arith.mulf %7, %8 : vector<16x1xf32>
    %10 = vector.broadcast %9 : vector<16x1xf32> to vector<16x32xf32>
    %11 = arith.mulf %1, %10 : vector<16x32xf32>
    %c0_i32 = arith.constant 0 : i32
    %c1_i32 = arith.constant 1 : i32
    %12 = arith.addi %c0_i32, %c1_i32 : i32
    %13 = arith.index_cast %12 : i32 to index
    %c0_4 = arith.constant 0 : index
    %c0_5 = arith.constant 0 : index
    %14 = vector.load %arg0[%13, %c0_4, %c0_5] : memref<8x16x32xf32, #tpu.memory_space<vmem>>, vector<1x16x32xf32>
    %15 = vector.shape_cast %14 : vector<1x16x32xf32> to vector<16x32xf32>
    %16 = arith.mulf %15, %15 : vector<16x32xf32>
    %cst_6 = arith.constant dense<0.000000e+00> : vector<16xf32>
    %17 = vector.multi_reduction <add>, %16, %cst_6 [1] : vector<16x32xf32> to vector<16xf32>
    %18 = vector.shape_cast %17 : vector<16xf32> to vector<16x1xf32>
    %cst_7 = arith.constant 1.000000e-24 : f32
    %19 = vector.broadcast %cst_7 : f32 to vector<16x1xf32>
    %20 = arith.maximumf %18, %19 : vector<16x1xf32>
    %21 = math.rsqrt %20 : vector<16x1xf32>
    %cst_8 = arith.constant 3.77964473 : f32
    %22 = vector.broadcast %cst_8 : f32 to vector<16x1xf32>
    %23 = arith.mulf %21, %22 : vector<16x1xf32>
    %24 = vector.broadcast %23 : vector<16x1xf32> to vector<16x32xf32>
    %25 = arith.mulf %15, %24 : vector<16x32xf32>
    %cst_9 = arith.constant dense<0.000000e+00> : vector<16x16xf32>
    %26 = tpu.matmul %11, %25, %cst_9 {dimension_numbers = #tpu.dot_dimension_numbers<[1], [1], [0], [0], [0, 0, 1, 0], [], []>} : vector<16x32xf32>, vector<16x32xf32>, vector<16x16xf32> -> vector<16x16xf32>
    %cst_10 = arith.constant dense<0xFF800000> : vector<16xf32>
    %27 = vector.multi_reduction <maximumf>, %26, %cst_10 [1] : vector<16x16xf32> to vector<16xf32>
    %28 = vector.shape_cast %27 : vector<16xf32> to vector<16x1xf32>
    %29 = vector.broadcast %28 : vector<16x1xf32> to vector<16x16xf32>
    %30 = arith.subf %26, %29 : vector<16x16xf32>
    %31 = math.exp %30 : vector<16x16xf32>
    %cst_11 = arith.constant dense<0.000000e+00> : vector<16xf32>
    %32 = vector.multi_reduction <add>, %31, %cst_11 [1] : vector<16x16xf32> to vector<16xf32>
    %33 = vector.shape_cast %32 : vector<16xf32> to vector<16x1xf32>
    %34 = tpu.reciprocal %33 {approx = true} : vector<16x1xf32> -> vector<16x1xf32>
    %35 = vector.broadcast %34 : vector<16x1xf32> to vector<16x16xf32>
    %36 = arith.mulf %31, %35 : vector<16x16xf32>
    %cst_12 = arith.constant dense<0xFF800000> : vector<16xf32>
    %37 = vector.multi_reduction <maximumf>, %26, %cst_12 [0] : vector<16x16xf32> to vector<16xf32>
    %38 = vector.shape_cast %37 : vector<16xf32> to vector<1x16xf32>
    %39 = vector.broadcast %38 : vector<1x16xf32> to vector<16x16xf32>
    %40 = arith.subf %26, %39 : vector<16x16xf32>
    %41 = math.exp %40 : vector<16x16xf32>
    %cst_13 = arith.constant dense<0.000000e+00> : vector<16xf32>
    %42 = vector.multi_reduction <add>, %41, %cst_13 [0] : vector<16x16xf32> to vector<16xf32>
    %43 = vector.shape_cast %42 : vector<16xf32> to vector<1x16xf32>
    %44 = tpu.reciprocal %43 {approx = true} : vector<1x16xf32> -> vector<1x16xf32>
    %45 = vector.broadcast %44 : vector<1x16xf32> to vector<16x16xf32>
    %46 = arith.mulf %41, %45 : vector<16x16xf32>
    %47 = arith.index_cast %c0_i32 : i32 to index
    %c0_14 = arith.constant 0 : index
    %c0_15 = arith.constant 0 : index
    %48 = vector.load %arg2[%47, %c0_14, %c0_15] : memref<7x16x16xf32, #tpu.memory_space<vmem>>, vector<1x16x16xf32>
    %49 = vector.shape_cast %48 : vector<1x16x16xf32> to vector<16x16xf32>
    %50 = vector.shape_cast %36 : vector<16x16xf32> to vector<1x16x16xf32>
    tpu.vector_store %arg2[%47, %c0_14, %c0_15], %50 {strides = array<i32>} : memref<7x16x16xf32, #tpu.memory_space<vmem>>, vector<1x16x16xf32>,
    %51 = arith.index_cast %c0_i32 : i32 to index
    %c0_16 = arith.constant 0 : index
    %c0_17 = arith.constant 0 : index
    %52 = vector.load %arg3[%51, %c0_16, %c0_17] : memref<7x16x16xf32, #tpu.memory_space<vmem>>, vector<1x16x16xf32>
    %53 = vector.shape_cast %52 : vector<1x16x16xf32> to vector<16x16xf32>
    %54 = vector.shape_cast %46 : vector<16x16xf32> to vector<1x16x16xf32>
    tpu.vector_store %arg3[%51, %c0_16, %c0_17], %54 {strides = array<i32>} : memref<7x16x16xf32, #tpu.memory_space<vmem>>, vector<1x16x16xf32>,
    %c1_i32_18 = arith.constant 1 : i32
    %c1_i32_19 = arith.constant 1 : i32
    %55 = arith.addi %c1_i32_18, %c1_i32_19 : i32
    %56 = arith.index_cast %55 : i32 to index
    %c0_20 = arith.constant 0 : index
    %c0_21 = arith.constant 0 : index
    %57 = vector.load %arg0[%56, %c0_20, %c0_21] : memref<8x16x32xf32, #tpu.memory_space<vmem>>, vector<1x16x32xf32>
    %58 = vector.shape_cast %57 : vector<1x16x32xf32> to vector<16x32xf32>
    %59 = arith.mulf %58, %58 : vector<16x32xf32>
    %cst_22 = arith.constant dense<0.000000e+00> : vector<16xf32>
    %60 = vector.multi_reduction <add>, %59, %cst_22 [1] : vector<16x32xf32> to vector<16xf32>
    %61 = vector.shape_cast %60 : vector<16xf32> to vector<16x1xf32>
    %cst_23 = arith.constant 1.000000e-24 : f32
    %62 = vector.broadcast %cst_23 : f32 to vector<16x1xf32>
    %63 = arith.maximumf %61, %62 : vector<16x1xf32>
    %64 = math.rsqrt %63 : vector<16x1xf32>
    %cst_24 = arith.constant 3.77964473 : f32
    %65 = vector.broadcast %cst_24 : f32 to vector<16x1xf32>
    %66 = arith.mulf %64, %65 : vector<16x1xf32>
    %67 = vector.broadcast %66 : vector<16x1xf32> to vector<16x32xf32>
    %68 = arith.mulf %58, %67 : vector<16x32xf32>
    %cst_25 = arith.constant dense<0.000000e+00> : vector<16x16xf32>
    %69 = tpu.matmul %25, %68, %cst_25 {dimension_numbers = #tpu.dot_dimension_numbers<[1], [1], [0], [0], [0, 0, 1, 0], [], []>} : vector<16x32xf32>, vector<16x32xf32>, vector<16x16xf32> -> vector<16x16xf32>
    %cst_26 = arith.constant dense<0xFF800000> : vector<16xf32>
    %70 = vector.multi_reduction <maximumf>, %69, %cst_26 [1] : vector<16x16xf32> to vector<16xf32>
    %71 = vector.shape_cast %70 : vector<16xf32> to vector<16x1xf32>
    %72 = vector.broadcast %71 : vector<16x1xf32> to vector<16x16xf32>
    %73 = arith.subf %69, %72 : vector<16x16xf32>
    %74 = math.exp %73 : vector<16x16xf32>
    %cst_27 = arith.constant dense<0.000000e+00> : vector<16xf32>
    %75 = vector.multi_reduction <add>, %74, %cst_27 [1] : vector<16x16xf32> to vector<16xf32>
    %76 = vector.shape_cast %75 : vector<16xf32> to vector<16x1xf32>
    %77 = tpu.reciprocal %76 {approx = true} : vector<16x1xf32> -> vector<16x1xf32>
    %78 = vector.broadcast %77 : vector<16x1xf32> to vector<16x16xf32>
    %79 = arith.mulf %74, %78 : vector<16x16xf32>
    %cst_28 = arith.constant dense<0xFF800000> : vector<16xf32>
    %80 = vector.multi_reduction <maximumf>, %69, %cst_28 [0] : vector<16x16xf32> to vector<16xf32>
    %81 = vector.shape_cast %80 : vector<16xf32> to vector<1x16xf32>
    %82 = vector.broadcast %81 : vector<1x16xf32> to vector<16x16xf32>
    %83 = arith.subf %69, %82 : vector<16x16xf32>
    %84 = math.exp %83 : vector<16x16xf32>
    %cst_29 = arith.constant dense<0.000000e+00> : vector<16xf32>
    %85 = vector.multi_reduction <add>, %84, %cst_29 [0] : vector<16x16xf32> to vector<16xf32>
    %86 = vector.shape_cast %85 : vector<16xf32> to vector<1x16xf32>
    %87 = tpu.reciprocal %86 {approx = true} : vector<1x16xf32> -> vector<1x16xf32>
    %88 = vector.broadcast %87 : vector<1x16xf32> to vector<16x16xf32>
    %89 = arith.mulf %84, %88 : vector<16x16xf32>
    %90 = arith.index_cast %c1_i32_18 : i32 to index
    %c0_30 = arith.constant 0 : index
    %c0_31 = arith.constant 0 : index
    %91 = vector.load %arg2[%90, %c0_30, %c0_31] : memref<7x16x16xf32, #tpu.memory_space<vmem>>, vector<1x16x16xf32>
    %92 = vector.shape_cast %91 : vector<1x16x16xf32> to vector<16x16xf32>
    %93 = vector.shape_cast %79 : vector<16x16xf32> to vector<1x16x16xf32>
    tpu.vector_store %arg2[%90, %c0_30, %c0_31], %93 {strides = array<i32>} : memref<7x16x16xf32, #tpu.memory_space<vmem>>, vector<1x16x16xf32>,
    %94 = arith.index_cast %c1_i32_18 : i32 to index
    %c0_32 = arith.constant 0 : index
    %c0_33 = arith.constant 0 : index
    %95 = vector.load %arg3[%94, %c0_32, %c0_33] : memref<7x16x16xf32, #tpu.memory_space<vmem>>, vector<1x16x16xf32>
    %96 = vector.shape_cast %95 : vector<1x16x16xf32> to vector<16x16xf32>
    %97 = vector.shape_cast %89 : vector<16x16xf32> to vector<1x16x16xf32>
    tpu.vector_store %arg3[%94, %c0_32, %c0_33], %97 {strides = array<i32>} : memref<7x16x16xf32, #tpu.memory_space<vmem>>, vector<1x16x16xf32>,
    %c2_i32 = arith.constant 2 : i32
    %c1_i32_34 = arith.constant 1 : i32
    %98 = arith.addi %c2_i32, %c1_i32_34 : i32
    %99 = arith.index_cast %98 : i32 to index
    %c0_35 = arith.constant 0 : index
    %c0_36 = arith.constant 0 : index
    %100 = vector.load %arg0[%99, %c0_35, %c0_36] : memref<8x16x32xf32, #tpu.memory_space<vmem>>, vector<1x16x32xf32>
    %101 = vector.shape_cast %100 : vector<1x16x32xf32> to vector<16x32xf32>
    %102 = arith.mulf %101, %101 : vector<16x32xf32>
    %cst_37 = arith.constant dense<0.000000e+00> : vector<16xf32>
    %103 = vector.multi_reduction <add>, %102, %cst_37 [1] : vector<16x32xf32> to vector<16xf32>
    %104 = vector.shape_cast %103 : vector<16xf32> to vector<16x1xf32>
    %cst_38 = arith.constant 1.000000e-24 : f32
    %105 = vector.broadcast %cst_38 : f32 to vector<16x1xf32>
    %106 = arith.maximumf %104, %105 : vector<16x1xf32>
    %107 = math.rsqrt %106 : vector<16x1xf32>
    %cst_39 = arith.constant 3.77964473 : f32
    %108 = vector.broadcast %cst_39 : f32 to vector<16x1xf32>
    %109 = arith.mulf %107, %108 : vector<16x1xf32>
    %110 = vector.broadcast %109 : vector<16x1xf32> to vector<16x32xf32>
    %111 = arith.mulf %101, %110 : vector<16x32xf32>
    %cst_40 = arith.constant dense<0.000000e+00> : vector<16x16xf32>
    %112 = tpu.matmul %68, %111, %cst_40 {dimension_numbers = #tpu.dot_dimension_numbers<[1], [1], [0], [0], [0, 0, 1, 0], [], []>} : vector<16x32xf32>, vector<16x32xf32>, vector<16x16xf32> -> vector<16x16xf32>
    %cst_41 = arith.constant dense<0xFF800000> : vector<16xf32>
    %113 = vector.multi_reduction <maximumf>, %112, %cst_41 [1] : vector<16x16xf32> to vector<16xf32>
    %114 = vector.shape_cast %113 : vector<16xf32> to vector<16x1xf32>
    %115 = vector.broadcast %114 : vector<16x1xf32> to vector<16x16xf32>
    %116 = arith.subf %112, %115 : vector<16x16xf32>
    %117 = math.exp %116 : vector<16x16xf32>
    %cst_42 = arith.constant dense<0.000000e+00> : vector<16xf32>
    %118 = vector.multi_reduction <add>, %117, %cst_42 [1] : vector<16x16xf32> to vector<16xf32>
    %119 = vector.shape_cast %118 : vector<16xf32> to vector<16x1xf32>
    %120 = tpu.reciprocal %119 {approx = true} : vector<16x1xf32> -> vector<16x1xf32>
    %121 = vector.broadcast %120 : vector<16x1xf32> to vector<16x16xf32>
    %122 = arith.mulf %117, %121 : vector<16x16xf32>
    %cst_43 = arith.constant dense<0xFF800000> : vector<16xf32>
    %123 = vector.multi_reduction <maximumf>, %112, %cst_43 [0] : vector<16x16xf32> to vector<16xf32>
    %124 = vector.shape_cast %123 : vector<16xf32> to vector<1x16xf32>
    %125 = vector.broadcast %124 : vector<1x16xf32> to vector<16x16xf32>
    %126 = arith.subf %112, %125 : vector<16x16xf32>
    %127 = math.exp %126 : vector<16x16xf32>
    %cst_44 = arith.constant dense<0.000000e+00> : vector<16xf32>
    %128 = vector.multi_reduction <add>, %127, %cst_44 [0] : vector<16x16xf32> to vector<16xf32>
    %129 = vector.shape_cast %128 : vector<16xf32> to vector<1x16xf32>
    %130 = tpu.reciprocal %129 {approx = true} : vector<1x16xf32> -> vector<1x16xf32>
    %131 = vector.broadcast %130 : vector<1x16xf32> to vector<16x16xf32>
    %132 = arith.mulf %127, %131 : vector<16x16xf32>
    %133 = arith.index_cast %c2_i32 : i32 to index
    %c0_45 = arith.constant 0 : index
    %c0_46 = arith.constant 0 : index
    %134 = vector.load %arg2[%133, %c0_45, %c0_46] : memref<7x16x16xf32, #tpu.memory_space<vmem>>, vector<1x16x16xf32>
    %135 = vector.shape_cast %134 : vector<1x16x16xf32> to vector<16x16xf32>
    %136 = vector.shape_cast %122 : vector<16x16xf32> to vector<1x16x16xf32>
    tpu.vector_store %arg2[%133, %c0_45, %c0_46], %136 {strides = array<i32>} : memref<7x16x16xf32, #tpu.memory_space<vmem>>, vector<1x16x16xf32>,
    %137 = arith.index_cast %c2_i32 : i32 to index
    %c0_47 = arith.constant 0 : index
    %c0_48 = arith.constant 0 : index
    %138 = vector.load %arg3[%137, %c0_47, %c0_48] : memref<7x16x16xf32, #tpu.memory_space<vmem>>, vector<1x16x16xf32>
    %139 = vector.shape_cast %138 : vector<1x16x16xf32> to vector<16x16xf32>
    %140 = vector.shape_cast %132 : vector<16x16xf32> to vector<1x16x16xf32>
    tpu.vector_store %arg3[%137, %c0_47, %c0_48], %140 {strides = array<i32>} : memref<7x16x16xf32, #tpu.memory_space<vmem>>, vector<1x16x16xf32>,
    %c3_i32 = arith.constant 3 : i32
    %c1_i32_49 = arith.constant 1 : i32
    %141 = arith.addi %c3_i32, %c1_i32_49 : i32
    %142 = arith.index_cast %141 : i32 to index
    %c0_50 = arith.constant 0 : index
    %c0_51 = arith.constant 0 : index
    %143 = vector.load %arg0[%142, %c0_50, %c0_51] : memref<8x16x32xf32, #tpu.memory_space<vmem>>, vector<1x16x32xf32>
    %144 = vector.shape_cast %143 : vector<1x16x32xf32> to vector<16x32xf32>
    %145 = arith.mulf %144, %144 : vector<16x32xf32>
    %cst_52 = arith.constant dense<0.000000e+00> : vector<16xf32>
    %146 = vector.multi_reduction <add>, %145, %cst_52 [1] : vector<16x32xf32> to vector<16xf32>
    %147 = vector.shape_cast %146 : vector<16xf32> to vector<16x1xf32>
    %cst_53 = arith.constant 1.000000e-24 : f32
    %148 = vector.broadcast %cst_53 : f32 to vector<16x1xf32>
    %149 = arith.maximumf %147, %148 : vector<16x1xf32>
    %150 = math.rsqrt %149 : vector<16x1xf32>
    %cst_54 = arith.constant 3.77964473 : f32
    %151 = vector.broadcast %cst_54 : f32 to vector<16x1xf32>
    %152 = arith.mulf %150, %151 : vector<16x1xf32>
    %153 = vector.broadcast %152 : vector<16x1xf32> to vector<16x32xf32>
    %154 = arith.mulf %144, %153 : vector<16x32xf32>
    %cst_55 = arith.constant dense<0.000000e+00> : vector<16x16xf32>
    %155 = tpu.matmul %111, %154, %cst_55 {dimension_numbers = #tpu.dot_dimension_numbers<[1], [1], [0], [0], [0, 0, 1, 0], [], []>} : vector<16x32xf32>, vector<16x32xf32>, vector<16x16xf32> -> vector<16x16xf32>
    %cst_56 = arith.constant dense<0xFF800000> : vector<16xf32>
    %156 = vector.multi_reduction <maximumf>, %155, %cst_56 [1] : vector<16x16xf32> to vector<16xf32>
    %157 = vector.shape_cast %156 : vector<16xf32> to vector<16x1xf32>
    %158 = vector.broadcast %157 : vector<16x1xf32> to vector<16x16xf32>
    %159 = arith.subf %155, %158 : vector<16x16xf32>
    %160 = math.exp %159 : vector<16x16xf32>
    %cst_57 = arith.constant dense<0.000000e+00> : vector<16xf32>
    %161 = vector.multi_reduction <add>, %160, %cst_57 [1] : vector<16x16xf32> to vector<16xf32>
    %162 = vector.shape_cast %161 : vector<16xf32> to vector<16x1xf32>
    %163 = tpu.reciprocal %162 {approx = true} : vector<16x1xf32> -> vector<16x1xf32>
    %164 = vector.broadcast %163 : vector<16x1xf32> to vector<16x16xf32>
    %165 = arith.mulf %160, %164 : vector<16x16xf32>
    %cst_58 = arith.constant dense<0xFF800000> : vector<16xf32>
    %166 = vector.multi_reduction <maximumf>, %155, %cst_58 [0] : vector<16x16xf32> to vector<16xf32>
    %167 = vector.shape_cast %166 : vector<16xf32> to vector<1x16xf32>
    %168 = vector.broadcast %167 : vector<1x16xf32> to vector<16x16xf32>
    %169 = arith.subf %155, %168 : vector<16x16xf32>
    %170 = math.exp %169 : vector<16x16xf32>
    %cst_59 = arith.constant dense<0.000000e+00> : vector<16xf32>
    %171 = vector.multi_reduction <add>, %170, %cst_59 [0] : vector<16x16xf32> to vector<16xf32>
    %172 = vector.shape_cast %171 : vector<16xf32> to vector<1x16xf32>
    %173 = tpu.reciprocal %172 {approx = true} : vector<1x16xf32> -> vector<1x16xf32>
    %174 = vector.broadcast %173 : vector<1x16xf32> to vector<16x16xf32>
    %175 = arith.mulf %170, %174 : vector<16x16xf32>
    %176 = arith.index_cast %c3_i32 : i32 to index
    %c0_60 = arith.constant 0 : index
    %c0_61 = arith.constant 0 : index
    %177 = vector.load %arg2[%176, %c0_60, %c0_61] : memref<7x16x16xf32, #tpu.memory_space<vmem>>, vector<1x16x16xf32>
    %178 = vector.shape_cast %177 : vector<1x16x16xf32> to vector<16x16xf32>
    %179 = vector.shape_cast %165 : vector<16x16xf32> to vector<1x16x16xf32>
    tpu.vector_store %arg2[%176, %c0_60, %c0_61], %179 {strides = array<i32>} : memref<7x16x16xf32, #tpu.memory_space<vmem>>, vector<1x16x16xf32>,
    %180 = arith.index_cast %c3_i32 : i32 to index
    %c0_62 = arith.constant 0 : index
    %c0_63 = arith.constant 0 : index
    %181 = vector.load %arg3[%180, %c0_62, %c0_63] : memref<7x16x16xf32, #tpu.memory_space<vmem>>, vector<1x16x16xf32>
    %182 = vector.shape_cast %181 : vector<1x16x16xf32> to vector<16x16xf32>
    %183 = vector.shape_cast %175 : vector<16x16xf32> to vector<1x16x16xf32>
    tpu.vector_store %arg3[%180, %c0_62, %c0_63], %183 {strides = array<i32>} : memref<7x16x16xf32, #tpu.memory_space<vmem>>, vector<1x16x16xf32>,
    %c4_i32 = arith.constant 4 : i32
    %c1_i32_64 = arith.constant 1 : i32
    %184 = arith.addi %c4_i32, %c1_i32_64 : i32
    %185 = arith.index_cast %184 : i32 to index
    %c0_65 = arith.constant 0 : index
    %c0_66 = arith.constant 0 : index
    %186 = vector.load %arg0[%185, %c0_65, %c0_66] : memref<8x16x32xf32, #tpu.memory_space<vmem>>, vector<1x16x32xf32>
    %187 = vector.shape_cast %186 : vector<1x16x32xf32> to vector<16x32xf32>
    %188 = arith.mulf %187, %187 : vector<16x32xf32>
    %cst_67 = arith.constant dense<0.000000e+00> : vector<16xf32>
    %189 = vector.multi_reduction <add>, %188, %cst_67 [1] : vector<16x32xf32> to vector<16xf32>
    %190 = vector.shape_cast %189 : vector<16xf32> to vector<16x1xf32>
    %cst_68 = arith.constant 1.000000e-24 : f32
    %191 = vector.broadcast %cst_68 : f32 to vector<16x1xf32>
    %192 = arith.maximumf %190, %191 : vector<16x1xf32>
    %193 = math.rsqrt %192 : vector<16x1xf32>
    %cst_69 = arith.constant 3.77964473 : f32
    %194 = vector.broadcast %cst_69 : f32 to vector<16x1xf32>
    %195 = arith.mulf %193, %194 : vector<16x1xf32>
    %196 = vector.broadcast %195 : vector<16x1xf32> to vector<16x32xf32>
    %197 = arith.mulf %187, %196 : vector<16x32xf32>
    %cst_70 = arith.constant dense<0.000000e+00> : vector<16x16xf32>
    %198 = tpu.matmul %154, %197, %cst_70 {dimension_numbers = #tpu.dot_dimension_numbers<[1], [1], [0], [0], [0, 0, 1, 0], [], []>} : vector<16x32xf32>, vector<16x32xf32>, vector<16x16xf32> -> vector<16x16xf32>
    %cst_71 = arith.constant dense<0xFF800000> : vector<16xf32>
    %199 = vector.multi_reduction <maximumf>, %198, %cst_71 [1] : vector<16x16xf32> to vector<16xf32>
    %200 = vector.shape_cast %199 : vector<16xf32> to vector<16x1xf32>
    %201 = vector.broadcast %200 : vector<16x1xf32> to vector<16x16xf32>
    %202 = arith.subf %198, %201 : vector<16x16xf32>
    %203 = math.exp %202 : vector<16x16xf32>
    %cst_72 = arith.constant dense<0.000000e+00> : vector<16xf32>
    %204 = vector.multi_reduction <add>, %203, %cst_72 [1] : vector<16x16xf32> to vector<16xf32>
    %205 = vector.shape_cast %204 : vector<16xf32> to vector<16x1xf32>
    %206 = tpu.reciprocal %205 {approx = true} : vector<16x1xf32> -> vector<16x1xf32>
    %207 = vector.broadcast %206 : vector<16x1xf32> to vector<16x16xf32>
    %208 = arith.mulf %203, %207 : vector<16x16xf32>
    %cst_73 = arith.constant dense<0xFF800000> : vector<16xf32>
    %209 = vector.multi_reduction <maximumf>, %198, %cst_73 [0] : vector<16x16xf32> to vector<16xf32>
    %210 = vector.shape_cast %209 : vector<16xf32> to vector<1x16xf32>
    %211 = vector.broadcast %210 : vector<1x16xf32> to vector<16x16xf32>
    %212 = arith.subf %198, %211 : vector<16x16xf32>
    %213 = math.exp %212 : vector<16x16xf32>
    %cst_74 = arith.constant dense<0.000000e+00> : vector<16xf32>
    %214 = vector.multi_reduction <add>, %213, %cst_74 [0] : vector<16x16xf32> to vector<16xf32>
    %215 = vector.shape_cast %214 : vector<16xf32> to vector<1x16xf32>
    %216 = tpu.reciprocal %215 {approx = true} : vector<1x16xf32> -> vector<1x16xf32>
    %217 = vector.broadcast %216 : vector<1x16xf32> to vector<16x16xf32>
    %218 = arith.mulf %213, %217 : vector<16x16xf32>
    %219 = arith.index_cast %c4_i32 : i32 to index
    %c0_75 = arith.constant 0 : index
    %c0_76 = arith.constant 0 : index
    %220 = vector.load %arg2[%219, %c0_75, %c0_76] : memref<7x16x16xf32, #tpu.memory_space<vmem>>, vector<1x16x16xf32>
    %221 = vector.shape_cast %220 : vector<1x16x16xf32> to vector<16x16xf32>
    %222 = vector.shape_cast %208 : vector<16x16xf32> to vector<1x16x16xf32>
    tpu.vector_store %arg2[%219, %c0_75, %c0_76], %222 {strides = array<i32>} : memref<7x16x16xf32, #tpu.memory_space<vmem>>, vector<1x16x16xf32>,
    %223 = arith.index_cast %c4_i32 : i32 to index
    %c0_77 = arith.constant 0 : index
    %c0_78 = arith.constant 0 : index
    %224 = vector.load %arg3[%223, %c0_77, %c0_78] : memref<7x16x16xf32, #tpu.memory_space<vmem>>, vector<1x16x16xf32>
    %225 = vector.shape_cast %224 : vector<1x16x16xf32> to vector<16x16xf32>
    %226 = vector.shape_cast %218 : vector<16x16xf32> to vector<1x16x16xf32>
    tpu.vector_store %arg3[%223, %c0_77, %c0_78], %226 {strides = array<i32>} : memref<7x16x16xf32, #tpu.memory_space<vmem>>, vector<1x16x16xf32>,
    %c5_i32 = arith.constant 5 : i32
    %c1_i32_79 = arith.constant 1 : i32
    %227 = arith.addi %c5_i32, %c1_i32_79 : i32
    %228 = arith.index_cast %227 : i32 to index
    %c0_80 = arith.constant 0 : index
    %c0_81 = arith.constant 0 : index
    %229 = vector.load %arg0[%228, %c0_80, %c0_81] : memref<8x16x32xf32, #tpu.memory_space<vmem>>, vector<1x16x32xf32>
    %230 = vector.shape_cast %229 : vector<1x16x32xf32> to vector<16x32xf32>
    %231 = arith.mulf %230, %230 : vector<16x32xf32>
    %cst_82 = arith.constant dense<0.000000e+00> : vector<16xf32>
    %232 = vector.multi_reduction <add>, %231, %cst_82 [1] : vector<16x32xf32> to vector<16xf32>
    %233 = vector.shape_cast %232 : vector<16xf32> to vector<16x1xf32>
    %cst_83 = arith.constant 1.000000e-24 : f32
    %234 = vector.broadcast %cst_83 : f32 to vector<16x1xf32>
    %235 = arith.maximumf %233, %234 : vector<16x1xf32>
    %236 = math.rsqrt %235 : vector<16x1xf32>
    %cst_84 = arith.constant 3.77964473 : f32
    %237 = vector.broadcast %cst_84 : f32 to vector<16x1xf32>
    %238 = arith.mulf %236, %237 : vector<16x1xf32>
    %239 = vector.broadcast %238 : vector<16x1xf32> to vector<16x32xf32>
    %240 = arith.mulf %230, %239 : vector<16x32xf32>
    %cst_85 = arith.constant dense<0.000000e+00> : vector<16x16xf32>
    %241 = tpu.matmul %197, %240, %cst_85 {dimension_numbers = #tpu.dot_dimension_numbers<[1], [1], [0], [0], [0, 0, 1, 0], [], []>} : vector<16x32xf32>, vector<16x32xf32>, vector<16x16xf32> -> vector<16x16xf32>
    %cst_86 = arith.constant dense<0xFF800000> : vector<16xf32>
    %242 = vector.multi_reduction <maximumf>, %241, %cst_86 [1] : vector<16x16xf32> to vector<16xf32>
    %243 = vector.shape_cast %242 : vector<16xf32> to vector<16x1xf32>
    %244 = vector.broadcast %243 : vector<16x1xf32> to vector<16x16xf32>
    %245 = arith.subf %241, %244 : vector<16x16xf32>
    %246 = math.exp %245 : vector<16x16xf32>
    %cst_87 = arith.constant dense<0.000000e+00> : vector<16xf32>
    %247 = vector.multi_reduction <add>, %246, %cst_87 [1] : vector<16x16xf32> to vector<16xf32>
    %248 = vector.shape_cast %247 : vector<16xf32> to vector<16x1xf32>
    %249 = tpu.reciprocal %248 {approx = true} : vector<16x1xf32> -> vector<16x1xf32>
    %250 = vector.broadcast %249 : vector<16x1xf32> to vector<16x16xf32>
    %251 = arith.mulf %246, %250 : vector<16x16xf32>
    %cst_88 = arith.constant dense<0xFF800000> : vector<16xf32>
    %252 = vector.multi_reduction <maximumf>, %241, %cst_88 [0] : vector<16x16xf32> to vector<16xf32>
    %253 = vector.shape_cast %252 : vector<16xf32> to vector<1x16xf32>
    %254 = vector.broadcast %253 : vector<1x16xf32> to vector<16x16xf32>
    %255 = arith.subf %241, %254 : vector<16x16xf32>
    %256 = math.exp %255 : vector<16x16xf32>
    %cst_89 = arith.constant dense<0.000000e+00> : vector<16xf32>
    %257 = vector.multi_reduction <add>, %256, %cst_89 [0] : vector<16x16xf32> to vector<16xf32>
    %258 = vector.shape_cast %257 : vector<16xf32> to vector<1x16xf32>
    %259 = tpu.reciprocal %258 {approx = true} : vector<1x16xf32> -> vector<1x16xf32>
    %260 = vector.broadcast %259 : vector<1x16xf32> to vector<16x16xf32>
    %261 = arith.mulf %256, %260 : vector<16x16xf32>
    %262 = arith.index_cast %c5_i32 : i32 to index
    %c0_90 = arith.constant 0 : index
    %c0_91 = arith.constant 0 : index
    %263 = vector.load %arg2[%262, %c0_90, %c0_91] : memref<7x16x16xf32, #tpu.memory_space<vmem>>, vector<1x16x16xf32>
    %264 = vector.shape_cast %263 : vector<1x16x16xf32> to vector<16x16xf32>
    %265 = vector.shape_cast %251 : vector<16x16xf32> to vector<1x16x16xf32>
    tpu.vector_store %arg2[%262, %c0_90, %c0_91], %265 {strides = array<i32>} : memref<7x16x16xf32, #tpu.memory_space<vmem>>, vector<1x16x16xf32>,
    %266 = arith.index_cast %c5_i32 : i32 to index
    %c0_92 = arith.constant 0 : index
    %c0_93 = arith.constant 0 : index
    %267 = vector.load %arg3[%266, %c0_92, %c0_93] : memref<7x16x16xf32, #tpu.memory_space<vmem>>, vector<1x16x16xf32>
    %268 = vector.shape_cast %267 : vector<1x16x16xf32> to vector<16x16xf32>
    %269 = vector.shape_cast %261 : vector<16x16xf32> to vector<1x16x16xf32>
    tpu.vector_store %arg3[%266, %c0_92, %c0_93], %269 {strides = array<i32>} : memref<7x16x16xf32, #tpu.memory_space<vmem>>, vector<1x16x16xf32>,
    %c6_i32 = arith.constant 6 : i32
    %c1_i32_94 = arith.constant 1 : i32
    %270 = arith.addi %c6_i32, %c1_i32_94 : i32
    %271 = arith.index_cast %270 : i32 to index
    %c0_95 = arith.constant 0 : index
    %c0_96 = arith.constant 0 : index
    %272 = vector.load %arg0[%271, %c0_95, %c0_96] : memref<8x16x32xf32, #tpu.memory_space<vmem>>, vector<1x16x32xf32>
    %273 = vector.shape_cast %272 : vector<1x16x32xf32> to vector<16x32xf32>
    %274 = arith.mulf %273, %273 : vector<16x32xf32>
    %cst_97 = arith.constant dense<0.000000e+00> : vector<16xf32>
    %275 = vector.multi_reduction <add>, %274, %cst_97 [1] : vector<16x32xf32> to vector<16xf32>
    %276 = vector.shape_cast %275 : vector<16xf32> to vector<16x1xf32>
    %cst_98 = arith.constant 1.000000e-24 : f32
    %277 = vector.broadcast %cst_98 : f32 to vector<16x1xf32>
    %278 = arith.maximumf %276, %277 : vector<16x1xf32>
    %279 = math.rsqrt %278 : vector<16x1xf32>
    %cst_99 = arith.constant 3.77964473 : f32
    %280 = vector.broadcast %cst_99 : f32 to vector<16x1xf32>
    %281 = arith.mulf %279, %280 : vector<16x1xf32>
    %282 = vector.broadcast %281 : vector<16x1xf32> to vector<16x32xf32>
    %283 = arith.mulf %273, %282 : vector<16x32xf32>
    %cst_100 = arith.constant dense<0.000000e+00> : vector<16x16xf32>
    %284 = tpu.matmul %240, %283, %cst_100 {dimension_numbers = #tpu.dot_dimension_numbers<[1], [1], [0], [0], [0, 0, 1, 0], [], []>} : vector<16x32xf32>, vector<16x32xf32>, vector<16x16xf32> -> vector<16x16xf32>
    %cst_101 = arith.constant dense<0xFF800000> : vector<16xf32>
    %285 = vector.multi_reduction <maximumf>, %284, %cst_101 [1] : vector<16x16xf32> to vector<16xf32>
    %286 = vector.shape_cast %285 : vector<16xf32> to vector<16x1xf32>
    %287 = vector.broadcast %286 : vector<16x1xf32> to vector<16x16xf32>
    %288 = arith.subf %284, %287 : vector<16x16xf32>
    %289 = math.exp %288 : vector<16x16xf32>
    %cst_102 = arith.constant dense<0.000000e+00> : vector<16xf32>
    %290 = vector.multi_reduction <add>, %289, %cst_102 [1] : vector<16x16xf32> to vector<16xf32>
    %291 = vector.shape_cast %290 : vector<16xf32> to vector<16x1xf32>
    %292 = tpu.reciprocal %291 {approx = true} : vector<16x1xf32> -> vector<16x1xf32>
    %293 = vector.broadcast %292 : vector<16x1xf32> to vector<16x16xf32>
    %294 = arith.mulf %289, %293 : vector<16x16xf32>
    %cst_103 = arith.constant dense<0xFF800000> : vector<16xf32>
    %295 = vector.multi_reduction <maximumf>, %284, %cst_103 [0] : vector<16x16xf32> to vector<16xf32>
    %296 = vector.shape_cast %295 : vector<16xf32> to vector<1x16xf32>
    %297 = vector.broadcast %296 : vector<1x16xf32> to vector<16x16xf32>
    %298 = arith.subf %284, %297 : vector<16x16xf32>
    %299 = math.exp %298 : vector<16x16xf32>
    %cst_104 = arith.constant dense<0.000000e+00> : vector<16xf32>
    %300 = vector.multi_reduction <add>, %299, %cst_104 [0] : vector<16x16xf32> to vector<16xf32>
    %301 = vector.shape_cast %300 : vector<16xf32> to vector<1x16xf32>
    %302 = tpu.reciprocal %301 {approx = true} : vector<1x16xf32> -> vector<1x16xf32>
    %303 = vector.broadcast %302 : vector<1x16xf32> to vector<16x16xf32>
    %304 = arith.mulf %299, %303 : vector<16x16xf32>
    %305 = arith.index_cast %c6_i32 : i32 to index
    %c0_105 = arith.constant 0 : index
    %c0_106 = arith.constant 0 : index
    %306 = vector.load %arg2[%305, %c0_105, %c0_106] : memref<7x16x16xf32, #tpu.memory_space<vmem>>, vector<1x16x16xf32>
    %307 = vector.shape_cast %306 : vector<1x16x16xf32> to vector<16x16xf32>
    %308 = vector.shape_cast %294 : vector<16x16xf32> to vector<1x16x16xf32>
    tpu.vector_store %arg2[%305, %c0_105, %c0_106], %308 {strides = array<i32>} : memref<7x16x16xf32, #tpu.memory_space<vmem>>, vector<1x16x16xf32>,
    %309 = arith.index_cast %c6_i32 : i32 to index
    %c0_107 = arith.constant 0 : index
    %c0_108 = arith.constant 0 : index
    %310 = vector.load %arg3[%309, %c0_107, %c0_108] : memref<7x16x16xf32, #tpu.memory_space<vmem>>, vector<1x16x16xf32>
    %311 = vector.shape_cast %310 : vector<1x16x16xf32> to vector<16x16xf32>
    %312 = vector.shape_cast %304 : vector<16x16xf32> to vector<1x16x16xf32>
    tpu.vector_store %arg3[%309, %c0_107, %c0_108], %312 {strides = array<i32>} : memref<7x16x16xf32, #tpu.memory_space<vmem>>, vector<1x16x16xf32>,
    %c7_i32 = arith.constant 7 : i32
    %c0_109 = arith.constant 0 : index
    %c0_110 = arith.constant 0 : index
    %c0_111 = arith.constant 0 : index
    %313 = vector.load %arg2[%c0_109, %c0_110, %c0_111] : memref<7x16x16xf32, #tpu.memory_space<vmem>>, vector<1x16x16xf32>
    %314 = vector.shape_cast %313 : vector<1x16x16xf32> to vector<16x16xf32>
    %c0_112 = arith.constant 0 : index
    %c0_113 = arith.constant 0 : index
    %c0_114 = arith.constant 0 : index
    %315 = vector.load %arg3[%c0_112, %c0_113, %c0_114] : memref<7x16x16xf32, #tpu.memory_space<vmem>>, vector<1x16x16xf32>
    %316 = vector.shape_cast %315 : vector<1x16x16xf32> to vector<16x16xf32>
    %cst_115 = arith.constant 0.000000e+00 : f32
    %317 = vector.broadcast %cst_115 : f32 to vector<1x1xf32>
    %c1_i32_116 = arith.constant 1 : i32
    %318 = arith.index_cast %c1_i32_116 : i32 to index
    %c0_117 = arith.constant 0 : index
    %c0_118 = arith.constant 0 : index
    %319 = vector.load %arg2[%318, %c0_117, %c0_118] : memref<7x16x16xf32, #tpu.memory_space<vmem>>, vector<1x16x16xf32>
    %320 = vector.shape_cast %319 : vector<1x16x16xf32> to vector<16x16xf32>
    %cst_119 = arith.constant dense<0.000000e+00> : vector<16x16xf32>
    %321 = tpu.matmul %314, %320, %cst_119 {dimension_numbers = #tpu.dot_dimension_numbers<[1], [0], [0], [1], [0, 0, 1, 1], [], []>} : vector<16x16xf32>, vector<16x16xf32>, vector<16x16xf32> -> vector<16x16xf32>
    %322 = arith.index_cast %c1_i32_116 : i32 to index
    %c0_120 = arith.constant 0 : index
    %c0_121 = arith.constant 0 : index
    %323 = vector.load %arg3[%322, %c0_120, %c0_121] : memref<7x16x16xf32, #tpu.memory_space<vmem>>, vector<1x16x16xf32>
    %324 = vector.shape_cast %323 : vector<1x16x16xf32> to vector<16x16xf32>
    %cst_122 = arith.constant dense<0.000000e+00> : vector<16x16xf32>
    %325 = tpu.matmul %316, %324, %cst_122 {dimension_numbers = #tpu.dot_dimension_numbers<[1], [0], [0], [1], [0, 0, 1, 1], [], []>} : vector<16x16xf32>, vector<16x16xf32>, vector<16x16xf32> -> vector<16x16xf32>
    %326 = arith.mulf %321, %325 : vector<16x16xf32>
    %cst_123 = arith.constant dense<0.000000e+00> : vector<16xf32>
    %327 = vector.multi_reduction <add>, %326, %cst_123 [1] : vector<16x16xf32> to vector<16xf32>
    %328 = vector.shape_cast %327 : vector<16xf32> to vector<16x1xf32>
    %cst_124 = arith.constant dense<0.000000e+00> : vector<16xf32>
    %329 = vector.multi_reduction <add>, %325, %cst_124 [0] : vector<16x16xf32> to vector<16xf32>
    %330 = vector.shape_cast %329 : vector<16xf32> to vector<1x16xf32>
    %331 = vector.broadcast %330 : vector<1x16xf32> to vector<16x16xf32>
    %332 = arith.mulf %321, %331 : vector<16x16xf32>
    %cst_125 = arith.constant dense<0.000000e+00> : vector<16xf32>
    %333 = vector.multi_reduction <add>, %332, %cst_125 [1] : vector<16x16xf32> to vector<16xf32>
    %334 = vector.shape_cast %333 : vector<16xf32> to vector<16x1xf32>
    %cst_126 = arith.constant 1.600000e-19 : f32
    %335 = vector.broadcast %cst_126 : f32 to vector<16x1xf32>
    %336 = arith.addf %334, %335 : vector<16x1xf32>
    %337 = math.log %336 : vector<16x1xf32>
    %cst_127 = arith.constant 9.99999968E-21 : f32
    %338 = vector.broadcast %cst_127 : f32 to vector<16x1xf32>
    %339 = arith.addf %328, %338 : vector<16x1xf32>
    %340 = math.log %339 : vector<16x1xf32>
    %341 = arith.subf %337, %340 : vector<16x1xf32>
    %cst_128 = arith.constant dense<0.000000e+00> : vector<1xf32>
    %342 = vector.multi_reduction <add>, %341, %cst_128 [0] : vector<16x1xf32> to vector<1xf32>
    %343 = vector.shape_cast %342 : vector<1xf32> to vector<1x1xf32>
    %cst_129 = arith.constant 6.250000e-02 : f32
    %344 = vector.broadcast %cst_129 : f32 to vector<1x1xf32>
    %345 = arith.mulf %343, %344 : vector<1x1xf32>
    %346 = arith.addf %317, %345 : vector<1x1xf32>
    %c2_i32_130 = arith.constant 2 : i32
    %347 = arith.index_cast %c2_i32_130 : i32 to index
    %c0_131 = arith.constant 0 : index
    %c0_132 = arith.constant 0 : index
    %348 = vector.load %arg2[%347, %c0_131, %c0_132] : memref<7x16x16xf32, #tpu.memory_space<vmem>>, vector<1x16x16xf32>
    %349 = vector.shape_cast %348 : vector<1x16x16xf32> to vector<16x16xf32>
    %cst_133 = arith.constant dense<0.000000e+00> : vector<16x16xf32>
    %350 = tpu.matmul %321, %349, %cst_133 {dimension_numbers = #tpu.dot_dimension_numbers<[1], [0], [0], [1], [0, 0, 1, 1], [], []>} : vector<16x16xf32>, vector<16x16xf32>, vector<16x16xf32> -> vector<16x16xf32>
    %351 = arith.index_cast %c2_i32_130 : i32 to index
    %c0_134 = arith.constant 0 : index
    %c0_135 = arith.constant 0 : index
    %352 = vector.load %arg3[%351, %c0_134, %c0_135] : memref<7x16x16xf32, #tpu.memory_space<vmem>>, vector<1x16x16xf32>
    %353 = vector.shape_cast %352 : vector<1x16x16xf32> to vector<16x16xf32>
    %cst_136 = arith.constant dense<0.000000e+00> : vector<16x16xf32>
    %354 = tpu.matmul %325, %353, %cst_136 {dimension_numbers = #tpu.dot_dimension_numbers<[1], [0], [0], [1], [0, 0, 1, 1], [], []>} : vector<16x16xf32>, vector<16x16xf32>, vector<16x16xf32> -> vector<16x16xf32>
    %355 = arith.mulf %350, %354 : vector<16x16xf32>
    %cst_137 = arith.constant dense<0.000000e+00> : vector<16xf32>
    %356 = vector.multi_reduction <add>, %355, %cst_137 [1] : vector<16x16xf32> to vector<16xf32>
    %357 = vector.shape_cast %356 : vector<16xf32> to vector<16x1xf32>
    %cst_138 = arith.constant dense<0.000000e+00> : vector<16xf32>
    %358 = vector.multi_reduction <add>, %354, %cst_138 [0] : vector<16x16xf32> to vector<16xf32>
    %359 = vector.shape_cast %358 : vector<16xf32> to vector<1x16xf32>
    %360 = vector.broadcast %359 : vector<1x16xf32> to vector<16x16xf32>
    %361 = arith.mulf %350, %360 : vector<16x16xf32>
    %cst_139 = arith.constant dense<0.000000e+00> : vector<16xf32>
    %362 = vector.multi_reduction <add>, %361, %cst_139 [1] : vector<16x16xf32> to vector<16xf32>
    %363 = vector.shape_cast %362 : vector<16xf32> to vector<16x1xf32>
    %cst_140 = arith.constant 1.600000e-19 : f32
    %364 = vector.broadcast %cst_140 : f32 to vector<16x1xf32>
    %365 = arith.addf %363, %364 : vector<16x1xf32>
    %366 = math.log %365 : vector<16x1xf32>
    %cst_141 = arith.constant 9.99999968E-21 : f32
    %367 = vector.broadcast %cst_141 : f32 to vector<16x1xf32>
    %368 = arith.addf %357, %367 : vector<16x1xf32>
    %369 = math.log %368 : vector<16x1xf32>
    %370 = arith.subf %366, %369 : vector<16x1xf32>
    %cst_142 = arith.constant dense<0.000000e+00> : vector<1xf32>
    %371 = vector.multi_reduction <add>, %370, %cst_142 [0] : vector<16x1xf32> to vector<1xf32>
    %372 = vector.shape_cast %371 : vector<1xf32> to vector<1x1xf32>
    %cst_143 = arith.constant 6.250000e-02 : f32
    %373 = vector.broadcast %cst_143 : f32 to vector<1x1xf32>
    %374 = arith.mulf %372, %373 : vector<1x1xf32>
    %375 = arith.addf %346, %374 : vector<1x1xf32>
    %c3_i32_144 = arith.constant 3 : i32
    %376 = arith.index_cast %c3_i32_144 : i32 to index
    %c0_145 = arith.constant 0 : index
    %c0_146 = arith.constant 0 : index
    %377 = vector.load %arg2[%376, %c0_145, %c0_146] : memref<7x16x16xf32, #tpu.memory_space<vmem>>, vector<1x16x16xf32>
    %378 = vector.shape_cast %377 : vector<1x16x16xf32> to vector<16x16xf32>
    %cst_147 = arith.constant dense<0.000000e+00> : vector<16x16xf32>
    %379 = tpu.matmul %350, %378, %cst_147 {dimension_numbers = #tpu.dot_dimension_numbers<[1], [0], [0], [1], [0, 0, 1, 1], [], []>} : vector<16x16xf32>, vector<16x16xf32>, vector<16x16xf32> -> vector<16x16xf32>
    %380 = arith.index_cast %c3_i32_144 : i32 to index
    %c0_148 = arith.constant 0 : index
    %c0_149 = arith.constant 0 : index
    %381 = vector.load %arg3[%380, %c0_148, %c0_149] : memref<7x16x16xf32, #tpu.memory_space<vmem>>, vector<1x16x16xf32>
    %382 = vector.shape_cast %381 : vector<1x16x16xf32> to vector<16x16xf32>
    %cst_150 = arith.constant dense<0.000000e+00> : vector<16x16xf32>
    %383 = tpu.matmul %354, %382, %cst_150 {dimension_numbers = #tpu.dot_dimension_numbers<[1], [0], [0], [1], [0, 0, 1, 1], [], []>} : vector<16x16xf32>, vector<16x16xf32>, vector<16x16xf32> -> vector<16x16xf32>
    %384 = arith.mulf %379, %383 : vector<16x16xf32>
    %cst_151 = arith.constant dense<0.000000e+00> : vector<16xf32>
    %385 = vector.multi_reduction <add>, %384, %cst_151 [1] : vector<16x16xf32> to vector<16xf32>
    %386 = vector.shape_cast %385 : vector<16xf32> to vector<16x1xf32>
    %cst_152 = arith.constant dense<0.000000e+00> : vector<16xf32>
    %387 = vector.multi_reduction <add>, %383, %cst_152 [0] : vector<16x16xf32> to vector<16xf32>
    %388 = vector.shape_cast %387 : vector<16xf32> to vector<1x16xf32>
    %389 = vector.broadcast %388 : vector<1x16xf32> to vector<16x16xf32>
    %390 = arith.mulf %379, %389 : vector<16x16xf32>
    %cst_153 = arith.constant dense<0.000000e+00> : vector<16xf32>
    %391 = vector.multi_reduction <add>, %390, %cst_153 [1] : vector<16x16xf32> to vector<16xf32>
    %392 = vector.shape_cast %391 : vector<16xf32> to vector<16x1xf32>
    %cst_154 = arith.constant 1.600000e-19 : f32
    %393 = vector.broadcast %cst_154 : f32 to vector<16x1xf32>
    %394 = arith.addf %392, %393 : vector<16x1xf32>
    %395 = math.log %394 : vector<16x1xf32>
    %cst_155 = arith.constant 9.99999968E-21 : f32
    %396 = vector.broadcast %cst_155 : f32 to vector<16x1xf32>
    %397 = arith.addf %386, %396 : vector<16x1xf32>
    %398 = math.log %397 : vector<16x1xf32>
    %399 = arith.subf %395, %398 : vector<16x1xf32>
    %cst_156 = arith.constant dense<0.000000e+00> : vector<1xf32>
    %400 = vector.multi_reduction <add>, %399, %cst_156 [0] : vector<16x1xf32> to vector<1xf32>
    %401 = vector.shape_cast %400 : vector<1xf32> to vector<1x1xf32>
    %cst_157 = arith.constant 6.250000e-02 : f32
    %402 = vector.broadcast %cst_157 : f32 to vector<1x1xf32>
    %403 = arith.mulf %401, %402 : vector<1x1xf32>
    %404 = arith.addf %375, %403 : vector<1x1xf32>
    %c4_i32_158 = arith.constant 4 : i32
    %405 = arith.index_cast %c4_i32_158 : i32 to index
    %c0_159 = arith.constant 0 : index
    %c0_160 = arith.constant 0 : index
    %406 = vector.load %arg2[%405, %c0_159, %c0_160] : memref<7x16x16xf32, #tpu.memory_space<vmem>>, vector<1x16x16xf32>
    %407 = vector.shape_cast %406 : vector<1x16x16xf32> to vector<16x16xf32>
    %cst_161 = arith.constant dense<0.000000e+00> : vector<16x16xf32>
    %408 = tpu.matmul %379, %407, %cst_161 {dimension_numbers = #tpu.dot_dimension_numbers<[1], [0], [0], [1], [0, 0, 1, 1], [], []>} : vector<16x16xf32>, vector<16x16xf32>, vector<16x16xf32> -> vector<16x16xf32>
    %409 = arith.index_cast %c4_i32_158 : i32 to index
    %c0_162 = arith.constant 0 : index
    %c0_163 = arith.constant 0 : index
    %410 = vector.load %arg3[%409, %c0_162, %c0_163] : memref<7x16x16xf32, #tpu.memory_space<vmem>>, vector<1x16x16xf32>
    %411 = vector.shape_cast %410 : vector<1x16x16xf32> to vector<16x16xf32>
    %cst_164 = arith.constant dense<0.000000e+00> : vector<16x16xf32>
    %412 = tpu.matmul %383, %411, %cst_164 {dimension_numbers = #tpu.dot_dimension_numbers<[1], [0], [0], [1], [0, 0, 1, 1], [], []>} : vector<16x16xf32>, vector<16x16xf32>, vector<16x16xf32> -> vector<16x16xf32>
    %413 = arith.mulf %408, %412 : vector<16x16xf32>
    %cst_165 = arith.constant dense<0.000000e+00> : vector<16xf32>
    %414 = vector.multi_reduction <add>, %413, %cst_165 [1] : vector<16x16xf32> to vector<16xf32>
    %415 = vector.shape_cast %414 : vector<16xf32> to vector<16x1xf32>
    %cst_166 = arith.constant dense<0.000000e+00> : vector<16xf32>
    %416 = vector.multi_reduction <add>, %412, %cst_166 [0] : vector<16x16xf32> to vector<16xf32>
    %417 = vector.shape_cast %416 : vector<16xf32> to vector<1x16xf32>
    %418 = vector.broadcast %417 : vector<1x16xf32> to vector<16x16xf32>
    %419 = arith.mulf %408, %418 : vector<16x16xf32>
    %cst_167 = arith.constant dense<0.000000e+00> : vector<16xf32>
    %420 = vector.multi_reduction <add>, %419, %cst_167 [1] : vector<16x16xf32> to vector<16xf32>
    %421 = vector.shape_cast %420 : vector<16xf32> to vector<16x1xf32>
    %cst_168 = arith.constant 1.600000e-19 : f32
    %422 = vector.broadcast %cst_168 : f32 to vector<16x1xf32>
    %423 = arith.addf %421, %422 : vector<16x1xf32>
    %424 = math.log %423 : vector<16x1xf32>
    %cst_169 = arith.constant 9.99999968E-21 : f32
    %425 = vector.broadcast %cst_169 : f32 to vector<16x1xf32>
    %426 = arith.addf %415, %425 : vector<16x1xf32>
    %427 = math.log %426 : vector<16x1xf32>
    %428 = arith.subf %424, %427 : vector<16x1xf32>
    %cst_170 = arith.constant dense<0.000000e+00> : vector<1xf32>
    %429 = vector.multi_reduction <add>, %428, %cst_170 [0] : vector<16x1xf32> to vector<1xf32>
    %430 = vector.shape_cast %429 : vector<1xf32> to vector<1x1xf32>
    %cst_171 = arith.constant 6.250000e-02 : f32
    %431 = vector.broadcast %cst_171 : f32 to vector<1x1xf32>
    %432 = arith.mulf %430, %431 : vector<1x1xf32>
    %433 = arith.addf %404, %432 : vector<1x1xf32>
    %c5_i32_172 = arith.constant 5 : i32
    %434 = arith.index_cast %c5_i32_172 : i32 to index
    %c0_173 = arith.constant 0 : index
    %c0_174 = arith.constant 0 : index
    %435 = vector.load %arg2[%434, %c0_173, %c0_174] : memref<7x16x16xf32, #tpu.memory_space<vmem>>, vector<1x16x16xf32>
    %436 = vector.shape_cast %435 : vector<1x16x16xf32> to vector<16x16xf32>
    %cst_175 = arith.constant dense<0.000000e+00> : vector<16x16xf32>
    %437 = tpu.matmul %408, %436, %cst_175 {dimension_numbers = #tpu.dot_dimension_numbers<[1], [0], [0], [1], [0, 0, 1, 1], [], []>} : vector<16x16xf32>, vector<16x16xf32>, vector<16x16xf32> -> vector<16x16xf32>
    %438 = arith.index_cast %c5_i32_172 : i32 to index
    %c0_176 = arith.constant 0 : index
    %c0_177 = arith.constant 0 : index
    %439 = vector.load %arg3[%438, %c0_176, %c0_177] : memref<7x16x16xf32, #tpu.memory_space<vmem>>, vector<1x16x16xf32>
    %440 = vector.shape_cast %439 : vector<1x16x16xf32> to vector<16x16xf32>
    %cst_178 = arith.constant dense<0.000000e+00> : vector<16x16xf32>
    %441 = tpu.matmul %412, %440, %cst_178 {dimension_numbers = #tpu.dot_dimension_numbers<[1], [0], [0], [1], [0, 0, 1, 1], [], []>} : vector<16x16xf32>, vector<16x16xf32>, vector<16x16xf32> -> vector<16x16xf32>
    %442 = arith.mulf %437, %441 : vector<16x16xf32>
    %cst_179 = arith.constant dense<0.000000e+00> : vector<16xf32>
    %443 = vector.multi_reduction <add>, %442, %cst_179 [1] : vector<16x16xf32> to vector<16xf32>
    %444 = vector.shape_cast %443 : vector<16xf32> to vector<16x1xf32>
    %cst_180 = arith.constant dense<0.000000e+00> : vector<16xf32>
    %445 = vector.multi_reduction <add>, %441, %cst_180 [0] : vector<16x16xf32> to vector<16xf32>
    %446 = vector.shape_cast %445 : vector<16xf32> to vector<1x16xf32>
    %447 = vector.broadcast %446 : vector<1x16xf32> to vector<16x16xf32>
    %448 = arith.mulf %437, %447 : vector<16x16xf32>
    %cst_181 = arith.constant dense<0.000000e+00> : vector<16xf32>
    %449 = vector.multi_reduction <add>, %448, %cst_181 [1] : vector<16x16xf32> to vector<16xf32>
    %450 = vector.shape_cast %449 : vector<16xf32> to vector<16x1xf32>
    %cst_182 = arith.constant 1.600000e-19 : f32
    %451 = vector.broadcast %cst_182 : f32 to vector<16x1xf32>
    %452 = arith.addf %450, %451 : vector<16x1xf32>
    %453 = math.log %452 : vector<16x1xf32>
    %cst_183 = arith.constant 9.99999968E-21 : f32
    %454 = vector.broadcast %cst_183 : f32 to vector<16x1xf32>
    %455 = arith.addf %444, %454 : vector<16x1xf32>
    %456 = math.log %455 : vector<16x1xf32>
    %457 = arith.subf %453, %456 : vector<16x1xf32>
    %cst_184 = arith.constant dense<0.000000e+00> : vector<1xf32>
    %458 = vector.multi_reduction <add>, %457, %cst_184 [0] : vector<16x1xf32> to vector<1xf32>
    %459 = vector.shape_cast %458 : vector<1xf32> to vector<1x1xf32>
    %cst_185 = arith.constant 6.250000e-02 : f32
    %460 = vector.broadcast %cst_185 : f32 to vector<1x1xf32>
    %461 = arith.mulf %459, %460 : vector<1x1xf32>
    %462 = arith.addf %433, %461 : vector<1x1xf32>
    %c6_i32_186 = arith.constant 6 : i32
    %463 = arith.index_cast %c6_i32_186 : i32 to index
    %c0_187 = arith.constant 0 : index
    %c0_188 = arith.constant 0 : index
    %464 = vector.load %arg2[%463, %c0_187, %c0_188] : memref<7x16x16xf32, #tpu.memory_space<vmem>>, vector<1x16x16xf32>
    %465 = vector.shape_cast %464 : vector<1x16x16xf32> to vector<16x16xf32>
    %cst_189 = arith.constant dense<0.000000e+00> : vector<16x16xf32>
    %466 = tpu.matmul %437, %465, %cst_189 {dimension_numbers = #tpu.dot_dimension_numbers<[1], [0], [0], [1], [0, 0, 1, 1], [], []>} : vector<16x16xf32>, vector<16x16xf32>, vector<16x16xf32> -> vector<16x16xf32>
    %467 = arith.index_cast %c6_i32_186 : i32 to index
    %c0_190 = arith.constant 0 : index
    %c0_191 = arith.constant 0 : index
    %468 = vector.load %arg3[%467, %c0_190, %c0_191] : memref<7x16x16xf32, #tpu.memory_space<vmem>>, vector<1x16x16xf32>
    %469 = vector.shape_cast %468 : vector<1x16x16xf32> to vector<16x16xf32>
    %cst_192 = arith.constant dense<0.000000e+00> : vector<16x16xf32>
    %470 = tpu.matmul %441, %469, %cst_192 {dimension_numbers = #tpu.dot_dimension_numbers<[1], [0], [0], [1], [0, 0, 1, 1], [], []>} : vector<16x16xf32>, vector<16x16xf32>, vector<16x16xf32> -> vector<16x16xf32>
    %471 = arith.mulf %466, %470 : vector<16x16xf32>
    %cst_193 = arith.constant dense<0.000000e+00> : vector<16xf32>
    %472 = vector.multi_reduction <add>, %471, %cst_193 [1] : vector<16x16xf32> to vector<16xf32>
    %473 = vector.shape_cast %472 : vector<16xf32> to vector<16x1xf32>
    %cst_194 = arith.constant dense<0.000000e+00> : vector<16xf32>
    %474 = vector.multi_reduction <add>, %470, %cst_194 [0] : vector<16x16xf32> to vector<16xf32>
    %475 = vector.shape_cast %474 : vector<16xf32> to vector<1x16xf32>
    %476 = vector.broadcast %475 : vector<1x16xf32> to vector<16x16xf32>
    %477 = arith.mulf %466, %476 : vector<16x16xf32>
    %cst_195 = arith.constant dense<0.000000e+00> : vector<16xf32>
    %478 = vector.multi_reduction <add>, %477, %cst_195 [1] : vector<16x16xf32> to vector<16xf32>
    %479 = vector.shape_cast %478 : vector<16xf32> to vector<16x1xf32>
    %cst_196 = arith.constant 1.600000e-19 : f32
    %480 = vector.broadcast %cst_196 : f32 to vector<16x1xf32>
    %481 = arith.addf %479, %480 : vector<16x1xf32>
    %482 = math.log %481 : vector<16x1xf32>
    %cst_197 = arith.constant 9.99999968E-21 : f32
    %483 = vector.broadcast %cst_197 : f32 to vector<16x1xf32>
    %484 = arith.addf %473, %483 : vector<16x1xf32>
    %485 = math.log %484 : vector<16x1xf32>
    %486 = arith.subf %482, %485 : vector<16x1xf32>
    %cst_198 = arith.constant dense<0.000000e+00> : vector<1xf32>
    %487 = vector.multi_reduction <add>, %486, %cst_198 [0] : vector<16x1xf32> to vector<1xf32>
    %488 = vector.shape_cast %487 : vector<1xf32> to vector<1x1xf32>
    %cst_199 = arith.constant 6.250000e-02 : f32
    %489 = vector.broadcast %cst_199 : f32 to vector<1x1xf32>
    %490 = arith.mulf %488, %489 : vector<1x1xf32>
    %491 = arith.addf %462, %490 : vector<1x1xf32>
    %c6_i32_200 = arith.constant 6 : i32
    %cst_201 = arith.constant 0.166666672 : f32
    %492 = vector.broadcast %cst_201 : f32 to vector<1x1xf32>
    %493 = arith.mulf %491, %492 : vector<1x1xf32>
    %c0_202 = arith.constant 0 : index
    %c0_203 = arith.constant 0 : index
    %494 = vector.load %arg1[%c0_202, %c0_203] : memref<1x1xf32, #tpu.memory_space<vmem>>, vector<1x1xf32>
    tpu.vector_store %arg1[%c0_202, %c0_203], %493 {strides = array<i32>} : memref<1x1xf32, #tpu.memory_space<vmem>>, vector<1x1xf32>,
    return
  }
}

</mosaic_0001>

<bundles_post_ra>
// kernel: crw_loss.1
= control target key start
LH: loop header
LB: loop body
LE: loop exit
PB: predicated region body
PF: predicated region fallthrough
CT: control target
= control target key end

     0   :  { %6 = vsyncpa [#allocation5], 0  ;;  %s3472_s0 = inlined_call_operand.hbm [shape: f32[8,16,32], index: 0, kind: input, shape index: {}]   ;;  %s3473_s1 = inlined_call_operand.hbm [shape: f32[1,1], index: 1, kind: output, shape index: {}]  }
   0x1   :  { %7 = vsyncpa [#allocation6], 0  ;;  %s3005_s6 = smov [#allocation4]   ;;  %s2957_s10 = scalar_lea.hbm %s3472_s0, 2048 }
   0x2   :  { %s13_s7 = sshll.u32 %s3005_s6, 4  ;;  %p2958_p0 = scmp.ne.s32.totalorder %s3472_s0, %s2957_s10  ;;  %s14_s7 = int_to_ptr.vmem [resolvable:$true] %s13_s7 }
   0x3   :  { %p2961_p1 = scmp.lt.u32.totalorder %s2957_s10, %s3472_s0 }
   0x5   :  { %p2963_p2 = pnand %p2961_p1, %p2958_p0 }
   0x7   :  { %2966 = shalt.err (!%p2963_p2)
}
   0x8   :  { %s2967_s15 = scalar_lea.vmem %s14_s7, 2048  ;;  %p2972_p4 = scmp.lt.s32.totalorder %s14_s7, %s14_s7 }
   0x9   :  { %p2968_p3 = scmp.ne.s32.totalorder %s14_s7, %s2967_s15  ;;  %p2973_p5 = scmp.lt.s32.totalorder %s2967_s15, %s2967_s15 }
   0xb   :  { %p2974_p6 = por %p2973_p5, %p2972_p4 }
   0xd   :  { %p2975_p7 = pnand %p2974_p6, %p2968_p3 }
   0xf   :  { %2978 = shalt.err (!%p2975_p7)
}
  0x10   :  { %s3006_s16 = smov 128   ;;  %s3007_s17 = smov 8  }
  0x11   :  { %19 = dma.hbm_to_vmem [thread:$0]  %s3472_s0, 2048, %s14_s7, [#allocation5], %s3006_s16, %s3006_s16, %s3007_s17  }
  0x12   :  { %3001 = dma.done.wait [#allocation5], 2048  }
  0x13   :  { %3002 = vsyncadd [#allocation5], 4294965248  ;;  %vm27_vm0 = vcmask 261120   ;;  %v3031_v0 = vld [vmem:[#allocation4 + $0x20] sm:$0xff]  ;;  %v43_v1 = vld [vmem:[#allocation4 + $0x10] sm:$0xff]  ;;  %vm148_vm2 = vcmask 130048  }
  0x14   :  { %v3033_v2 = vld [vmem:[#allocation4 + $0x28] sm:$0xff]  ;;  %v203_v3 = vmul.f32 %v3031_v0, %v3031_v0  ;;  %v45_v4 = vmul.f32 %v43_v1, %v43_v1  ;;  %v3039_v6 = vld [vmem:[#allocation4 + $0x18] sm:$0xff]  ;;  %v3045_v9 = vld [vmem:[#allocation4] sm:$0xff]  ;;  %s3008_s0 = smov [#allocation7]   ;;  %vm2407_vm3 = vcmask 0  }
  0x15   :  { %v204_v5 = vmul.f32 %v3033_v2, %v3033_v2  ;;  %v46_v7 = vmul.f32 %v3039_v6, %v3039_v6  ;;  %v3043_v8 = vld [vmem:[#allocation4 + $0x8] sm:$0xff]  ;;  %v25_v15 = vmul.f32 %v3045_v9, %v3045_v9  ;;  %v3055_v16 = vld [vmem:[#allocation4 + $0x38] sm:$0xff]  ;;  %v3057_v17 = vld [vmem:[#allocation4 + $0x30] sm:$0xff]  ;;  %s2415_s20 = sshll.u32 %s3008_s0, 4  ;;  %s2416_s20 = int_to_ptr.vmem [resolvable:$true] %s2415_s20 }
  0x16   :  { %v205_v10 = vsel %vm27_vm0, %v203_v3, 0.0  ;;  %v47_v11 = vsel %vm27_vm0, %v45_v4, 0.0  ;;  %v26_v14 = vmul.f32 %v3043_v8, %v3043_v8  ;;  %v357_v20 = vmul.f32 %v3055_v16, %v3055_v16  ;;  %vm3073_vm1 = vmpackc.low %vm27_vm0, %vm27_vm0  ;;  %s2979_s21 = scalar_lea.vmem %s2416_s20, 16  ;;  %s2983_s22 = scalar_lea.vmem %s2416_s20, 32 }
  0x17   :  { %206 = vadd.xlane.f32.xlu0 %v205_v10  ;;  %48 = vadd.xlane.f32.xlu1 %v47_v11  ;;  %v208_v12 = vsel %vm27_vm0, %v204_v5, 0.0  ;;  %v50_v13 = vsel %vm27_vm0, %v46_v7, 0.0  ;;  %v28_v19 = vsel %vm27_vm0, %v25_v15, 0.0  ;;  %v356_v21 = vmul.f32 %v3057_v17, %v3057_v17  ;;  %v3104_v5 = vld [vmem:[#allocation4 + $0x48] sm:$0xff]  ;;  %p2980_p8 = scmp.ne.s32.totalorder %s2416_s20, %s2979_s21  ;;  %p2984_p9 = scmp.lt.s32.totalorder %s2416_s20, %s2416_s20 }
  0x18   :  { %v31_v18 = vsel %vm27_vm0, %v26_v14, 0.0  ;;  %v361_v22 = vsel %vm27_vm0, %v357_v20, 0.0  ;;  %v510_v15 = vmul.f32 %v3104_v5, %v3104_v5  ;;  %p2985_p10 = scmp.lt.s32.totalorder %s2983_s22, %s2979_s21 }
  0x19   :  { %v358_v23 = vsel %vm27_vm0, %v356_v21, 0.0 }
  0x1a   :  { %v514_v21 = vsel %vm27_vm0, %v510_v15, 0.0  ;;  %p2986_p11 = por %p2985_p10, %p2984_p9 }
  0x1b   :  { %209 = vadd.xlane.f32.xlu0 %v208_v12  ;;  %51 = vadd.xlane.f32.xlu1 %v50_v13 }
  0x1c   :  { %p2987_p12 = pnand %p2986_p11, %p2980_p8 }
  0x1f   :  { %32 = vadd.xlane.f32.xlu1 %v31_v18  ;;  %29 = vadd.xlane.f32.xlu0 %v28_v19 }
  0x23   :  { %362 = vadd.xlane.f32.xlu1 %v361_v22  ;;  %359 = vadd.xlane.f32.xlu0 %v358_v23 }
  0xa4   :  { %v207_v24 = vpop.xlane.xlu0 %206  ;;  %v49_v25 = vpop.xlane.xlu1 %48 }
  0xa5   :  { %v211_v26 = vmax.f32 %v207_v24, 1e-24  ;;  %v53_v27 = vmax.f32 %v49_v25, 1e-24 }
  0xa7   :  { %2779 = vrsqrt.f32 %v211_v26 }
  0xa8   :  { %2781 = vrsqrt.f32 %v53_v27  ;;  %v210_v28 = vpop.xlane.xlu0 %209  ;;  %v52_v29 = vpop.xlane.xlu1 %51 }
  0xa9   :  { %v212_v30 = vmax.f32 %v210_v28, 1e-24  ;;  %v54_v31 = vmax.f32 %v52_v29, 1e-24 }
  0xab   :  { %2783 = vrsqrt.f32 %v212_v30 }
  0xac   :  { %2785 = vrsqrt.f32 %v54_v31  ;;  %v33_v32 = vpop.xlane.xlu1 %32  ;;  %v30_v33 = vpop.xlane.xlu0 %29 }
  0xad   :  { %v35_v34 = vmax.f32 %v33_v32, 1e-24  ;;  %v34_v35 = vmax.f32 %v30_v33, 1e-24 }
  0xaf   :  { %2787 = vrsqrt.f32 %v35_v34 }
  0xb0   :  { %2789 = vrsqrt.f32 %v34_v35  ;;  %v363_v36 = vpop.xlane.xlu1 %362  ;;  %v360_v37 = vpop.xlane.xlu0 %359 }
  0xb1   :  { %v2780_v38 = vpop.eup %2779  ;;  %v365_v39 = vmax.f32 %v363_v36, 1e-24  ;;  %v364_v40 = vmax.f32 %v360_v37, 1e-24 }
  0xb2   :  { %v2782_v41 = vpop.eup %2781  ;;  %v215_v43 = vmul.f32 3.7796447, %v2780_v38 }
  0xb3   :  { %2791 = vrsqrt.f32 %v365_v39  ;;  %v57_v42 = vmul.f32 3.7796447, %v2782_v41 }
  0xb4   :  { %2793 = vrsqrt.f32 %v364_v40  ;;  %v217_v49 = vmul.f32 %v215_v43, %v3031_v0 }
  0xb5   :  { %v2784_v44 = vpop.eup %2783  ;;  %v59_v45 = vmul.f32 %v57_v42, %v43_v1 }
  0xb6   :  { %v2786_v46 = vpop.eup %2785  ;;  %v216_v47 = vmul.f32 3.7796447, %v2784_v44 }
  0xb7   :  { %v58_v48 = vmul.f32 3.7796447, %v2786_v46  ;;  %2563 = vmatprep.mubr.msk.f32.mxu1 %vm27_vm0, %v59_v45 }
  0xb8   :  { %v218_v50 = vmul.f32 %v216_v47, %v3033_v2 }
  0xb9   :  { %v2788_v51 = vpop.eup %2787  ;;  %v60_v52 = vmul.f32 %v58_v48, %v3039_v6 }
  0xba   :  { %v2790_v54 = vpop.eup %2789  ;;  %v2691_v55 = vpack.c.bf16 %v218_v50, %v217_v49  ;;  %v39_v59 = vmul.f32 3.7796447, %v2788_v51 }
  0xbb   :  { %v2685_v56 = vpack.c.bf16 %v60_v52, %v59_v45  ;;  %v38_v57 = vmul.f32 3.7796447, %v2790_v54  ;;  %v3148_v54 = vld [vmem:[#allocation4 + $0x68] sm:$0xff] }
  0xbc   :  { %2693 = vmatprep.subr.msk.bf16.mxu1 %vm3073_vm1, %v2691_v55  ;;  %v41_v1 = vmul.f32 %v39_v59, %v3043_v8 }
  0xbd   :  { %v2792_v58 = vpop.eup %2791  ;;  %2687 = vmatprep.subr.msk.bf16.mxu0 %vm3073_vm1, %v2685_v56  ;;  %2696 = vmatpush3.bf16.xpose.msk.msra.mxu1 %vm3073_vm1, %v2691_v55  ;;  %v40_v60 = vmul.f32 %v38_v57, %v3045_v9  ;;  %v3112_v9 = vld [vmem:[#allocation4 + $0x40] sm:$0xff] }
  0xbe   :  { %v2794_v61 = vpop.eup %2793  ;;  %v369_v62 = vmul.f32 3.7796447, %v2792_v58  ;;  %2690 = vmatpush3.bf16.xpose.msk.msra.mxu0 %vm3073_vm1, %v2685_v56  ;;  %v3150_v55 = vld [vmem:[#allocation4 + $0x60] sm:$0xff]  ;;  %v816_v56 = vmul.f32 %v3148_v54, %v3148_v54 }
  0xbf   :  { %v368_v63 = vmul.f32 3.7796447, %v2794_v61  ;;  %2556 = vmatprep.mubr.msk.f32.mxu0 %vm27_vm0, %v40_v60  ;;  %v815_v57 = vmul.f32 %v3150_v55, %v3150_v55 }
  0xc0   :  { %v3088_v0 = vmul.f32 %v369_v62, %v3055_v16  ;;  %v820_v60 = vsel %vm27_vm0, %v816_v56, 0.0 }
  0xc1   :  { %v370_v2 = vmul.f32 %v368_v63, %v3057_v17  ;;  %v509_v17 = vmul.f32 %v3112_v9, %v3112_v9  ;;  %v817_v61 = vsel %vm27_vm0, %v815_v57, 0.0 }
  0xc3   :  { %v2697_v3 = vpack.c.bf16 %v3088_v0, %v370_v2  ;;  %v511_v23 = vsel %vm27_vm0, %v509_v17, 0.0 }
  0xc4   :  { %2564 = vmatmul.mubr.msk.f32.vlgmr.msra.gmra.mrb[0].mxu1 %vm27_vm0, %v60_v52 }
  0xc5   :  { %2557 = vmatmul.mubr.msk.f32.vlgmr.msra.gmra.mrb[0].mxu0 %vm27_vm0, %v41_v1  ;;  %2699 = vmatprep.subr.msk.bf16.mxu0 %vm3073_vm1, %v2697_v3 }
  0xc6   :  { %2702 = vmatpush3.bf16.xpose.msk.msra.mxu0 %vm3073_vm1, %v2697_v3  ;;  %2570 = vmatprep.mubr.msk.f32.mxu0 %vm27_vm0, %v217_v49 }
  0xc7   :  { %2577 = vmatprep.mubr.msk.f32.mxu1 %vm27_vm0, %v370_v2 }
  0xcd   :  { %2571 = vmatmul.mubr.msk.f32.vlgmr.msra.gmra.mrb[2].mxu0 %vm27_vm0, %v218_v50 }
 0x197   :  { %v3102_v4 = vpop.f32.mrb[0].mxu1 }
 0x198   :  { %v3106_v6 = vpop.f32.mrb[0].mxu0  ;;  %v3108_v7 = vpop.f32.mrb[1].mxu1  ;;  %v303_v8 = vsel %vm148_vm2, %v3102_v4, -inf }
 0x199   :  { %v3114_v10 = vpop.f32.mrb[1].mxu0  ;;  %304 = vmax.xlane.f32.xlu1 %v303_v8  ;;  %v300_v11 = vsel %vm148_vm2, %v3108_v7, -inf  ;;  %v152_v12 = vsel %vm148_vm2, %v3106_v6, -inf }
 0x19a   :  { %v322_v13 = vmax.f32 %v300_v11, %v303_v8  ;;  %301 = vmax.xlane.f32.xlu0 %v300_v11  ;;  %v149_v14 = vsel %vm148_vm2, %v3114_v10, -inf }
 0x19b   :  { %v171_v16 = vmax.f32 %v149_v14, %v152_v12 }
 0x19c   :  { %v323_v18 = vrot.slane %v322_v13, 4 }
 0x19d   :  { %153 = vmax.xlane.f32.xlu1 %v152_v12  ;;  %v172_v19 = vrot.slane %v171_v16, 4 }
 0x19e   :  { %v324_v20 = vmax.f32 %v322_v13, %v323_v18  ;;  %150 = vmax.xlane.f32.xlu0 %v149_v14 }
 0x19f   :  { %v173_v22 = vmax.f32 %v171_v16, %v172_v19 }
 0x1a0   :  { %v325_v24 = vrot.slane %v324_v20, 2  ;;  %v3128_v25 = vpop.f32.mrb[2].mxu0 }
 0x1a1   :  { %v174_v26 = vrot.slane %v173_v22, 2  ;;  %v3130_v27 = vpop.f32.mrb[3].mxu0  ;;  %515 = vadd.xlane.f32.xlu1 %v514_v21  ;;  %v3134_v28 = vsel %vm148_vm2, %v3128_v25, -inf }
 0x1a2   :  { %v326_v29 = vmax.f32 %v324_v20, %v325_v24  ;;  %512 = vadd.xlane.f32.xlu0 %v511_v23  ;;  %v3138_v30 = vsel %vm148_vm2, %v3130_v27, -inf }
 0x1a3   :  { %v175_v31 = vmax.f32 %v173_v22, %v174_v26  ;;  %v475_v32 = vmax.f32 %v3138_v30, %v3134_v28 }
 0x1a4   :  { %v327_v33 = vrot.slane %v326_v29, 1 }
 0x1a5   :  { %v176_v34 = vrot.slane %v175_v31, 1  ;;  %v476_v35 = vrot.slane %v475_v32, 4  ;;  %821 = vadd.xlane.f32.xlu1 %v820_v60 }
 0x1a6   :  { %v328_v36 = vmax.f32 %v326_v29, %v327_v33  ;;  %818 = vadd.xlane.f32.xlu0 %v817_v61 }
 0x1a7   :  { %v177_v37 = vmax.f32 %v175_v31, %v176_v34  ;;  %v477_v38 = vmax.f32 %v475_v32, %v476_v35 }
 0x1a8   :  { %v329_v39 = vsub.f32 %v3108_v7, %v328_v36  ;;  %v330_v40 = vsub.f32 %v3102_v4, %v328_v36 }
 0x1a9   :  { %v178_v41 = vsub.f32 %v3114_v10, %v177_v37  ;;  %v179_v42 = vsub.f32 %v3106_v6, %v177_v37  ;;  %v478_v43 = vrot.slane %v477_v38, 2 }
 0x1aa   :  { %v331_v44 = vmul.f32 1.442695, %v329_v39  ;;  %v333_v45 = vmul.f32 1.442695, %v330_v40 }
 0x1ab   :  { %v180_v46 = vmul.f32 1.442695, %v178_v41  ;;  %v182_v47 = vmul.f32 1.442695, %v179_v42  ;;  %v479_v48 = vmax.f32 %v477_v38, %v478_v43 }
 0x1ac   :  { %2795 = vpow2.f32 %v331_v44 }
 0x1ad   :  { %2797 = vpow2.f32 %v333_v45  ;;  %v480_v49 = vrot.slane %v479_v48, 1 }
 0x1ae   :  { %2799 = vpow2.f32 %v180_v46 }
 0x1af   :  { %2801 = vpow2.f32 %v182_v47  ;;  %v481_v50 = vmax.f32 %v479_v48, %v480_v49 }
 0x1b1   :  { %v482_v51 = vsub.f32 %v3130_v27, %v481_v50  ;;  %v483_v52 = vsub.f32 %v3128_v25, %v481_v50 }
 0x1b3   :  { %v484_v58 = vmul.f32 1.442695, %v482_v51  ;;  %v486_v59 = vmul.f32 1.442695, %v483_v52 }
 0x1b5   :  { %2803 = vpow2.f32 %v484_v58 }
 0x1b6   :  { %v2796_v62 = vpop.eup %2795  ;;  %2805 = vpow2.f32 %v486_v59 }
 0x1b7   :  { %v2798_v63 = vpop.eup %2797  ;;  %v335_v1 = vsel %vm148_vm2, %v2796_v62, 0.0 }
 0x1b8   :  { %v2800_v2 = vpop.eup %2799  ;;  %v336_v3 = vsel %vm148_vm2, %v2798_v63, 0.0 }
 0x1b9   :  { %v2802_v8 = vpop.eup %2801  ;;  %v337_v11 = vadd.f32 %v336_v3, %v335_v1  ;;  %v184_v12 = vsel %vm148_vm2, %v2800_v2, 0.0 }
 0x1ba   :  { %v185_v13 = vsel %vm148_vm2, %v2802_v8, 0.0 }
 0x1bb   :  { %v338_v14 = vrot.slane %v337_v11, 4  ;;  %v186_v15 = vadd.f32 %v185_v13, %v184_v12  ;;  %v3180_v13 = vld [vmem:[#allocation4 + $0x58] sm:$0xff] }
 0x1bd   :  { %v339_v16 = vadd.f32 %v338_v14, %v337_v11  ;;  %v187_v17 = vrot.slane %v186_v15, 4 }
 0x1bf   :  { %v2804_v18 = vpop.eup %2803  ;;  %v340_v19 = vrot.slane %v339_v16, 2  ;;  %v188_v20 = vadd.f32 %v187_v17, %v186_v15  ;;  %v663_v17 = vmul.f32 %v3180_v13, %v3180_v13 }
 0x1c0   :  { %v2806_v21 = vpop.eup %2805  ;;  %v488_v22 = vsel %vm148_vm2, %v2804_v18, 0.0 }
 0x1c1   :  { %v341_v23 = vadd.f32 %v340_v19, %v339_v16  ;;  %v189_v24 = vrot.slane %v188_v20, 2  ;;  %v489_v26 = vsel %vm148_vm2, %v2806_v21, 0.0 }
 0x1c2   :  { %v490_v29 = vadd.f32 %v489_v26, %v488_v22 }
 0x1c3   :  { %v342_v31 = vrot.slane %v341_v23, 1  ;;  %v190_v32 = vadd.f32 %v189_v24, %v188_v20  ;;  %v667_v24 = vsel %vm27_vm0, %v663_v17, 0.0 }
 0x1c4   :  { %v491_v33 = vrot.slane %v490_v29, 4 }
 0x1c5   :  { %v343_v34 = vadd.f32 %v342_v31, %v341_v23  ;;  %v191_v35 = vrot.slane %v190_v32, 1 }
 0x1c6   :  { %v492_v36 = vadd.f32 %v491_v33, %v490_v29  ;;  %v3198_v29 = vld [vmem:[#allocation4 + $0x78] sm:$0xff] }
 0x1c7   :  { %2807 = vrcp.f32 %v343_v34  ;;  %v192_v37 = vadd.f32 %v191_v35, %v190_v32  ;;  %v3203_v32 = vld [vmem:[#allocation4 + $0x70] sm:$0xff]  ;;  %v969_v35 = vmul.f32 %v3198_v29, %v3198_v29 }
 0x1c8   :  { %v493_v38 = vrot.slane %v492_v36, 2 }
 0x1c9   :  { %2809 = vrcp.f32 %v192_v37  ;;  %v968_v37 = vmul.f32 %v3203_v32, %v3203_v32 }
 0x1ca   :  { %v494_v39 = vadd.f32 %v493_v38, %v492_v36  ;;  %v973_v38 = vsel %vm27_vm0, %v969_v35, 0.0 }
 0x1cc   :  { %v495_v40 = vrot.slane %v494_v39, 1 }
 0x1ce   :  { %v496_v41 = vadd.f32 %v495_v40, %v494_v39 }
 0x1d0   :  { %2811 = vrcp.f32 %v496_v41  ;;  %v970_v41 = vsel %vm27_vm0, %v968_v37, 0.0 }
 0x1d1   :  { %v2808_v42 = vpop.eup %2807 }
 0x1d2   :  { %v345_v43 = vmul.f32 %v2808_v42, %v2796_v62  ;;  %v346_v44 = vmul.f32 %v2808_v42, %v2798_v63 }
 0x1d3   :  { %v2810_v45 = vpop.eup %2809 }
 0x1d4   :  { %351 = vst.msk [vmem:[#allocation3 + $0x10] sm:$0xff] %vm148_vm2, %v345_v43  ;;  %352 = vst.msk [vmem:[#allocation3 + $0x18] sm:$0xff] %vm148_vm2, %v346_v44  ;;  %v194_v46 = vmul.f32 %v2810_v45, %v2800_v2  ;;  %v195_v47 = vmul.f32 %v2810_v45, %v2802_v8 }
 0x1d6   :  { %198 = vst.msk [vmem:[#allocation3] sm:$0xff] %vm148_vm2, %v194_v46  ;;  %199 = vst.msk [vmem:[#allocation3 + $0x8] sm:$0xff] %vm148_vm2, %v195_v47 }
 0x1da   :  { %v2812_v48 = vpop.eup %2811 }
 0x1db   :  { %v498_v49 = vmul.f32 %v2812_v48, %v2804_v18  ;;  %v499_v50 = vmul.f32 %v2812_v48, %v2806_v21 }
 0x1dd   :  { %504 = vst.msk [vmem:[#allocation3 + $0x20] sm:$0xff] %vm148_vm2, %v498_v49  ;;  %505 = vst.msk [vmem:[#allocation3 + $0x28] sm:$0xff] %vm148_vm2, %v499_v50 }
 0x1e4   :  { %v1420_v35 = vld [vmem:[#allocation3 + $0x28] sm:$0xff] }
 0x226   :  { %v305_v51 = vpop.xlane.xlu1 %304 }
 0x227   :  { %v307_v52 = vsub.f32 %v3102_v4, %v305_v51  ;;  %v302_v56 = vpop.xlane.xlu0 %301 }
 0x228   :  { %v306_v57 = vsub.f32 %v3108_v7, %v302_v56  ;;  %v3174_v7 = vld [vmem:[#allocation4 + $0x50] sm:$0xff] }
 0x229   :  { %v310_v58 = vmul.f32 1.442695, %v307_v52  ;;  %v662_v12 = vmul.f32 %v3174_v7, %v3174_v7 }
 0x22a   :  { %v308_v59 = vmul.f32 1.442695, %v306_v57  ;;  %v154_v60 = vpop.xlane.xlu1 %153 }
 0x22b   :  { %2813 = vpow2.f32 %v310_v58  ;;  %v156_v61 = vsub.f32 %v3106_v6, %v154_v60  ;;  %v151_v62 = vpop.xlane.xlu0 %150  ;;  %v664_v16 = vsel %vm27_vm0, %v662_v12, 0.0 }
 0x22c   :  { %2815 = vpow2.f32 %v308_v59  ;;  %v155_v63 = vsub.f32 %v3114_v10, %v151_v62 }
 0x22d   :  { %v159_v1 = vmul.f32 1.442695, %v156_v61 }
 0x22e   :  { %v157_v2 = vmul.f32 1.442695, %v155_v63  ;;  %v516_v3 = vpop.xlane.xlu1 %515 }
 0x22f   :  { %2817 = vpow2.f32 %v159_v1  ;;  %v518_v8 = vmax.f32 %v516_v3, 1e-24  ;;  %v513_v11 = vpop.xlane.xlu0 %512 }
 0x230   :  { %2819 = vpow2.f32 %v157_v2  ;;  %v517_v4 = vmax.f32 %v513_v11, 1e-24 }
 0x231   :  { %2821 = vrsqrt.f32 %v518_v8 }
 0x232   :  { %2823 = vrsqrt.f32 %v517_v4 }
 0x235   :  { %v3178_v6 = vpop.eup %2813 }
 0x236   :  { %v3182_v10 = vpop.eup %2815  ;;  %v315_v14 = vsel %vm148_vm2, %v3178_v6, 0.0 }
 0x237   :  { %316 = vadd.xlane.f32.xlu1 %v315_v14  ;;  %v312_v15 = vsel %vm148_vm2, %v3182_v10, 0.0 }
 0x238   :  { %313 = vadd.xlane.f32.xlu0 %v312_v15 }
 0x239   :  { %v3191_v18 = vpop.eup %2817 }
 0x23a   :  { %v3193_v19 = vpop.eup %2819  ;;  %v164_v34 = vsel %vm148_vm2, %v3191_v18, 0.0 }
 0x23b   :  { %v2822_v20 = vpop.eup %2821  ;;  %665 = vadd.xlane.f32.xlu1 %v664_v16  ;;  %v161_v21 = vsel %vm148_vm2, %v3193_v19, 0.0 }
 0x23c   :  { %v2824_v22 = vpop.eup %2823  ;;  %v522_v23 = vmul.f32 3.7796447, %v2822_v20  ;;  %162 = vadd.xlane.f32.xlu0 %v161_v21  ;;  %v1205_v21 = vld [vmem:[#allocation3 + $0x10] sm:$0xff] }
 0x23d   :  { %v521_v26 = vmul.f32 3.7796447, %v2824_v22  ;;  %v1206_v22 = vld [vmem:[#allocation3 + $0x18] sm:$0xff] }
 0x23e   :  { %v3201_v31 = vmul.f32 %v522_v23, %v3104_v5  ;;  %v822_v5 = vpop.xlane.xlu1 %821 }
 0x23f   :  { %v523_v33 = vmul.f32 %v521_v26, %v3112_v9  ;;  %668 = vadd.xlane.f32.xlu1 %v667_v24  ;;  %v819_v9 = vpop.xlane.xlu0 %818  ;;  %v824_v39 = vmax.f32 %v822_v5, 1e-24  ;;  %v2731_v24 = vpack.c.bf16 %v1206_v22, %v1205_v21 }
 0x240   :  { %165 = vadd.xlane.f32.xlu0 %v164_v34  ;;  %v823_v40 = vmax.f32 %v819_v9, 1e-24  ;;  %v1419_v34 = vld [vmem:[#allocation3 + $0x20] sm:$0xff] }
 0x241   :  { %v2703_v36 = vpack.c.bf16 %v3201_v31, %v523_v33  ;;  %2584 = vmatprep.mubr.msk.f32.mxu0 %vm27_vm0, %v523_v33  ;;  %2825 = vrsqrt.f32 %v824_v39 }
 0x242   :  { %2827 = vrsqrt.f32 %v823_v40  ;;  %v1120_v40 = vld [vmem:[#allocation3] sm:$0xff] }
 0x243   :  { %457 = vmax.xlane.f32.xlu1 %v3134_v28  ;;  %2705 = vmatprep.subr.msk.bf16.mxu1 %vm3073_vm1, %v2703_v36 }
 0x244   :  { %454 = vmax.xlane.f32.xlu0 %v3138_v30  ;;  %2708 = vmatpush3.bf16.xpose.msk.msra.mxu1 %vm3073_vm1, %v2703_v36 }
 0x247   :  { %974 = vadd.xlane.f32.xlu1 %v973_v38 }
 0x248   :  { %971 = vadd.xlane.f32.xlu0 %v970_v41  ;;  %v2739_v41 = vpack.c.bf16 %v1420_v35, %v1419_v34 }
 0x24b   :  { %2578 = vmatmul.mubr.msk.f32.vlgmr.msra.gmra.mrb[2].mxu1 %vm27_vm0, %v3088_v0  ;;  %v2826_v28 = vpop.eup %2825 }
 0x24c   :  { %v2828_v42 = vpop.eup %2827  ;;  %v828_v43 = vmul.f32 3.7796447, %v2826_v28 }
 0x24d   :  { %v827_v30 = vmul.f32 3.7796447, %v2828_v42 }
 0x24e   :  { %v3225_v44 = vmul.f32 %v828_v43, %v3148_v54  ;;  %v1121_v43 = vld [vmem:[#allocation3 + $0x8] sm:$0xff] }
 0x24f   :  { %v3228_v45 = vmul.f32 %v827_v30, %v3150_v55 }
 0x251   :  { %v2715_v46 = vpack.c.bf16 %v3225_v44, %v3228_v45 }
 0x253   :  { %2717 = vmatprep.subr.msk.bf16.mxu1 %vm3073_vm1, %v2715_v46 }
 0x254   :  { %2720 = vmatpush3.bf16.xpose.msk.msra.mxu1 %vm3073_vm1, %v2715_v46 }
 0x2c4   :  { %v317_v0 = vpop.xlane.xlu1 %316 }
 0x2c5   :  { %2829 = vrcp.f32 %v317_v0  ;;  %v314_v47 = vpop.xlane.xlu0 %313 }
 0x2c6   :  { %2831 = vrcp.f32 %v314_v47 }
 0x2c8   :  { %v666_v48 = vpop.xlane.xlu1 %665 }
 0x2c9   :  { %v670_v49 = vmax.f32 %v666_v48, 1e-24  ;;  %v163_v54 = vpop.xlane.xlu0 %162 }
 0x2ca   :  { %2833 = vrcp.f32 %v163_v54 }
 0x2cb   :  { %2835 = vrsqrt.f32 %v670_v49 }
 0x2cc   :  { %v669_v55 = vpop.xlane.xlu1 %668 }
 0x2cd   :  { %v671_v50 = vmax.f32 %v669_v55, 1e-24  ;;  %v166_v51 = vpop.xlane.xlu0 %165 }
 0x2ce   :  { %2837 = vrcp.f32 %v166_v51 }
 0x2cf   :  { %v2830_v52 = vpop.eup %2829  ;;  %2839 = vrsqrt.f32 %v671_v50 }
 0x2d0   :  { %v2832_v56 = vpop.eup %2831  ;;  %v321_v57 = vmul.f32 %v2830_v52, %v3178_v6  ;;  %v458_v58 = vpop.xlane.xlu1 %457 }
 0x2d1   :  { %v320_v59 = vmul.f32 %v2832_v56, %v3182_v10  ;;  %v460_v60 = vsub.f32 %v3128_v25, %v458_v58  ;;  %v455_v61 = vpop.xlane.xlu0 %454 }
 0x2d2   :  { %349 = vst.msk [vmem:[#allocation2 + $0x18] sm:$0xff] %vm148_vm2, %v321_v57  ;;  %v459_v62 = vsub.f32 %v3130_v27, %v455_v61 }
 0x2d3   :  { %348 = vst.msk [vmem:[#allocation2 + $0x10] sm:$0xff] %vm148_vm2, %v320_v59  ;;  %v463_v63 = vmul.f32 1.442695, %v460_v60 }
 0x2d4   :  { %v2834_v1 = vpop.eup %2833  ;;  %v461_v2 = vmul.f32 1.442695, %v459_v62  ;;  %v975_v3 = vpop.xlane.xlu1 %974 }
 0x2d5   :  { %v2836_v8 = vpop.eup %2835  ;;  %v169_v11 = vmul.f32 %v2834_v1, %v3193_v19  ;;  %2841 = vpow2.f32 %v463_v63  ;;  %v977_v4 = vmax.f32 %v975_v3, 1e-24  ;;  %v972_v12 = vpop.xlane.xlu0 %971 }
 0x2d6   :  { %v674_v6 = vmul.f32 3.7796447, %v2836_v8  ;;  %2843 = vpow2.f32 %v461_v2  ;;  %v976_v25 = vmax.f32 %v972_v12, 1e-24 }
 0x2d7   :  { %196 = vst.msk [vmem:[#allocation2] sm:$0xff] %vm148_vm2, %v169_v11  ;;  %2845 = vrsqrt.f32 %v977_v4 }
 0x2d8   :  { %v2838_v10 = vpop.eup %2837  ;;  %v676_v27 = vmul.f32 %v674_v6, %v3174_v7  ;;  %2847 = vrsqrt.f32 %v976_v25 }
 0x2d9   :  { %v2840_v14 = vpop.eup %2839  ;;  %v170_v15 = vmul.f32 %v2838_v10, %v3191_v18  ;;  %v1123_v16 = vld [vmem:[#allocation2 + $0x18] sm:$0xff] }
 0x2da   :  { %v675_v17 = vmul.f32 3.7796447, %v2840_v14  ;;  %2591 = vmatprep.mubr.msk.f32.mxu1 %vm27_vm0, %v676_v27  ;;  %v1122_v19 = vld [vmem:[#allocation2 + $0x10] sm:$0xff] }
 0x2db   :  { %197 = vst.msk [vmem:[#allocation2 + $0x8] sm:$0xff] %vm148_vm2, %v170_v15  ;;  %v2727_v20 = vpack.c.bf16 %v1123_v16, %v1122_v19 }
 0x2dc   :  { %v677_v23 = vmul.f32 %v675_v17, %v3180_v13 }
 0x2dd   :  { %2728 = vmatprep.subr.bf16.mxu1 %v2727_v20 }
 0x2de   :  { %2592 = vmatmul.mubr.msk.f32.vlgmr.msra.gmra.mrb[4].mxu1 %vm27_vm0, %v677_v23  ;;  %v1118_v7 = vld [vmem:[#allocation2] sm:$0xff]  ;;  %v2709_v26 = vpack.c.bf16 %v677_v23, %v676_v27 }
 0x2df   :  { %v3250_v33 = vpop.eup %2841  ;;  %2730 = vmatpush3.bf16.msra.mxu1 %v2727_v20  ;;  %2605 = vmatprep.mubr.msk.f32.mxu1 %vm148_vm2, %v1118_v7 }
 0x2e0   :  { %v3253_v18 = vpop.eup %2843  ;;  %2732 = vmatprep.subr.bf16.mxu1 %v2731_v24  ;;  %2711 = vmatprep.subr.msk.bf16.mxu0 %vm3073_vm1, %v2709_v26  ;;  %v468_v13 = vsel %vm148_vm2, %v3250_v33, 0.0 }
 0x2e1   :  { %v2846_v36 = vpop.eup %2845  ;;  %2714 = vmatpush3.bf16.xpose.msk.msra.mxu0 %vm3073_vm1, %v2709_v26  ;;  %469 = vadd.xlane.f32.xlu1 %v468_v13  ;;  %v465_v37 = vsel %vm148_vm2, %v3253_v18, 0.0 }
 0x2e2   :  { %v2848_v5 = vpop.eup %2847  ;;  %v981_v9 = vmul.f32 3.7796447, %v2846_v36  ;;  %466 = vadd.xlane.f32.xlu0 %v465_v37  ;;  %v1119_v38 = vld [vmem:[#allocation2 + $0x8] sm:$0xff] }
 0x2e3   :  { %v980_v39 = vmul.f32 3.7796447, %v2848_v5  ;;  %2606 = vmatmul.mubr.msk.f32.vlgmr.msra.gmra.mrb[6].mxu1 %vm148_vm2, %v1119_v38 }
 0x2e4   :  { %v983_v28 = vmul.f32 %v981_v9, %v3198_v29  ;;  %2734 = vmatpush3.bf16.msra.mxu1 %v2731_v24  ;;  %2612 = vmatprep.mubr.msk.f32.mxu1 %vm148_vm2, %v1120_v40 }
 0x2e5   :  { %v982_v42 = vmul.f32 %v980_v39, %v3203_v32  ;;  %2740 = vmatprep.subr.bf16.mxu1 %v2739_v41 }
 0x2e7   :  { %2613 = vmatmul.mubr.msk.f32.vlgmr.msra.gmra.mrb[8].mxu1 %vm148_vm2, %v1121_v43  ;;  %v2721_v30 = vpack.c.bf16 %v983_v28, %v982_v42 }
 0x2e8   :  { %2742 = vmatpush3.bf16.msra.mxu1 %v2739_v41  ;;  %2585 = vmatmul.mubr.msk.f32.vlgmr.msra.gmra.mrb[4].mxu0 %vm27_vm0, %v3201_v31 }
 0x2e9   :  { %2723 = vmatprep.subr.msk.bf16.mxu0 %vm3073_vm1, %v2721_v30  ;;  %2598 = vmatprep.mubr.msk.f32.mxu0 %vm27_vm0, %v3228_v45 }
 0x2ea   :  { %2726 = vmatpush3.bf16.xpose.msk.msra.mxu0 %vm3073_vm1, %v2721_v30 }
 0x2f1   :  { %2599 = vmatmul.mubr.msk.f32.vlgmr.msra.gmra.mrb[6].mxu0 %vm27_vm0, %v3225_v44 }
 0x31e   :  { %v2579_v29 = vpop.f32.mrb[2].mxu1 }
 0x31f   :  { %v597_v32 = vpop.f32.mrb[3].mxu1  ;;  %v609_v46 = vsel %vm148_vm2, %v2579_v29, -inf }
 0x320   :  { %610 = vmax.xlane.f32.xlu1 %v609_v46  ;;  %v606_v0 = vsel %vm148_vm2, %v597_v32, -inf }
 0x321   :  { %v628_v31 = vmax.f32 %v606_v0, %v609_v46  ;;  %607 = vmax.xlane.f32.xlu0 %v606_v0 }
 0x323   :  { %v629_v47 = vrot.slane %v628_v31, 4 }
 0x325   :  { %v630_v48 = vmax.f32 %v628_v31, %v629_v47 }
 0x327   :  { %v631_v49 = vrot.slane %v630_v48, 2 }
 0x329   :  { %v632_v54 = vmax.f32 %v630_v48, %v631_v49 }
 0x32b   :  { %v633_v45 = vrot.slane %v632_v54, 1 }
 0x32d   :  { %v634_v55 = vmax.f32 %v632_v54, %v633_v45 }
 0x32f   :  { %v635_v53 = vsub.f32 %v597_v32, %v634_v55  ;;  %v636_v50 = vsub.f32 %v2579_v29, %v634_v55 }
 0x331   :  { %v637_v51 = vmul.f32 1.442695, %v635_v53  ;;  %v639_v52 = vmul.f32 1.442695, %v636_v50 }
 0x333   :  { %2849 = vpow2.f32 %v637_v51 }
 0x334   :  { %2851 = vpow2.f32 %v639_v52 }
 0x33d   :  { %v2850_v44 = vpop.eup %2849 }
 0x33e   :  { %v2852_v56 = vpop.eup %2851  ;;  %v641_v57 = vsel %vm148_vm2, %v2850_v44, 0.0 }
 0x33f   :  { %v642_v58 = vsel %vm148_vm2, %v2852_v56, 0.0 }
 0x340   :  { %v643_v59 = vadd.f32 %v642_v58, %v641_v57 }
 0x342   :  { %v644_v60 = vrot.slane %v643_v59, 4 }
 0x344   :  { %v645_v61 = vadd.f32 %v644_v60, %v643_v59 }
 0x346   :  { %v646_v62 = vrot.slane %v645_v61, 2 }
 0x348   :  { %v647_v63 = vadd.f32 %v646_v62, %v645_v61 }
 0x34a   :  { %v648_v1 = vrot.slane %v647_v63, 1 }
 0x34c   :  { %v649_v2 = vadd.f32 %v648_v1, %v647_v63 }
 0x34e   :  { %2853 = vrcp.f32 %v649_v2 }
 0x358   :  { %v2854_v3 = vpop.eup %2853 }
 0x359   :  { %v651_v8 = vmul.f32 %v2854_v3, %v2850_v44  ;;  %v652_v11 = vmul.f32 %v2854_v3, %v2852_v56 }
 0x35b   :  { %657 = vst.msk [vmem:[#allocation3 + $0x30] sm:$0xff] %vm148_vm2, %v651_v8  ;;  %658 = vst.msk [vmem:[#allocation3 + $0x38] sm:$0xff] %vm148_vm2, %v652_v11 }
 0x362   :  { %v1633_v4 = vld [vmem:[#allocation3 + $0x30] sm:$0xff]  ;;  %v1634_v12 = vld [vmem:[#allocation3 + $0x38] sm:$0xff] }
 0x363   :  { %v2747_v6 = vpack.c.bf16 %v1634_v12, %v1633_v4 }
 0x365   :  { %2748 = vmatprep.subr.bf16.mxu1 %v2747_v6 }
 0x36e   :  { %v470_v25 = vpop.xlane.xlu1 %469 }
 0x36f   :  { %2855 = vrcp.f32 %v470_v25  ;;  %v467_v10 = vpop.xlane.xlu0 %466 }
 0x370   :  { %2857 = vrcp.f32 %v467_v10 }
 0x379   :  { %v2856_v27 = vpop.eup %2855 }
 0x37a   :  { %v2858_v14 = vpop.eup %2857  ;;  %v474_v15 = vmul.f32 %v2856_v27, %v3250_v33 }
 0x37b   :  { %v473_v16 = vmul.f32 %v2858_v14, %v3253_v18 }
 0x37c   :  { %502 = vst.msk [vmem:[#allocation2 + $0x28] sm:$0xff] %vm148_vm2, %v474_v15 }
 0x37d   :  { %501 = vst.msk [vmem:[#allocation2 + $0x20] sm:$0xff] %vm148_vm2, %v473_v16 }
 0x383   :  { %v1337_v17 = vld [vmem:[#allocation2 + $0x28] sm:$0xff] }
 0x384   :  { %v1336_v19 = vld [vmem:[#allocation2 + $0x20] sm:$0xff] }
 0x385   :  { %v2735_v20 = vpack.c.bf16 %v1337_v17, %v1336_v19 }
 0x387   :  { %2736 = vmatprep.subr.bf16.mxu0 %v2735_v20 }
 0x388   :  { %2738 = vmatpush3.bf16.msra.mxu0 %v2735_v20 }
 0x3ad   :  { %v611_v21 = vpop.xlane.xlu1 %610 }
 0x3ae   :  { %v613_v22 = vsub.f32 %v2579_v29, %v611_v21  ;;  %v608_v23 = vpop.xlane.xlu0 %607 }
 0x3af   :  { %v612_v7 = vsub.f32 %v597_v32, %v608_v23 }
 0x3b0   :  { %v616_v24 = vmul.f32 1.442695, %v613_v22 }
 0x3b1   :  { %v614_v26 = vmul.f32 1.442695, %v612_v7  ;;  %v3288_v13 = vpop.f32.mrb[4].mxu1 }
 0x3b2   :  { %2859 = vpow2.f32 %v616_v24  ;;  %v3290_v33 = vpop.f32.mrb[5].mxu1  ;;  %v3294_v18 = vsel %vm148_vm2, %v3288_v13, -inf }
 0x3b3   :  { %2861 = vpow2.f32 %v614_v26  ;;  %v3298_v34 = vsel %vm148_vm2, %v3290_v33, -inf }
 0x3b4   :  { %v934_v35 = vmax.f32 %v3298_v34, %v3294_v18 }
 0x3b6   :  { %v2607_v36 = vpop.f32.mrb[6].mxu1  ;;  %v935_v37 = vrot.slane %v934_v35, 4 }
 0x3b7   :  { %v1196_v5 = vpop.f32.mrb[7].mxu1 }
 0x3b8   :  { %2619 = vmatprep.mubr.msk.f32.mxu0 %vm148_vm2, %v1196_v5  ;;  %v936_v9 = vmax.f32 %v934_v35, %v935_v37 }
 0x3b9   :  { %2620 = vmatmul.mubr.msk.f32.vlgmr.msra.gmra.mrb[8].mxu0 %vm148_vm2, %v2607_v36 }
 0x3ba   :  { %v2614_v38 = vpop.f32.mrb[8].mxu1  ;;  %v937_v39 = vrot.slane %v936_v9, 2 }
 0x3bb   :  { %v1297_v40 = vsel %vm148_vm2, %v2614_v38, 0.0  ;;  %v3305_v41 = vpop.f32.mrb[4].mxu0  ;;  %v1279_v28 = vpop.f32.mrb[9].mxu1  ;;  %v3307_v42 = vmul.f32 %v2614_v38, %v2607_v36 }
 0x3bc   :  { %v3309_v43 = vpop.eup %2859  ;;  %v1296_v30 = vsel %vm148_vm2, %v1279_v28, 0.0  ;;  %v3312_v29 = vpop.f32.mrb[5].mxu0  ;;  %2626 = vmatprep.mubr.msk.f32.mxu1 %vm148_vm2, %v1279_v28  ;;  %v762_v32 = vsel %vm148_vm2, %v3305_v41, -inf  ;;  %v938_v46 = vmax.f32 %v936_v9, %v937_v39  ;;  %v3317_v0 = vmul.f32 %v1279_v28, %v1196_v5 }
 0x3bd   :  { %v3319_v31 = vpop.eup %2861  ;;  %v1298_v47 = vadd.f32 %v1297_v40, %v1296_v30  ;;  %2627 = vmatmul.mubr.msk.f32.vlgmr.msra.gmra.mrb[10].mxu1 %vm148_vm2, %v2614_v38  ;;  %v621_v48 = vsel %vm148_vm2, %v3309_v43, 0.0  ;;  %v759_v49 = vsel %vm148_vm2, %v3312_v29, -inf }
 0x3be   :  { %2750 = vmatpush3.bf16.msra.mxu1 %v2747_v6  ;;  %622 = vadd.xlane.f32.xlu1 %v621_v48  ;;  %v618_v54 = vsel %vm148_vm2, %v3319_v31, 0.0  ;;  %v781_v45 = vmax.f32 %v759_v49, %v762_v32  ;;  %v939_v55 = vrot.slane %v938_v46, 1 }
 0x3bf   :  { %v1299_v53 = vrot.slane %v1298_v47, 4  ;;  %619 = vadd.xlane.f32.xlu0 %v618_v54 }
 0x3c0   :  { %v782_v50 = vrot.slane %v781_v45, 4  ;;  %v940_v51 = vmax.f32 %v938_v46, %v939_v55 }
 0x3c1   :  { %v1300_v52 = vadd.f32 %v1299_v53, %v1298_v47 }
 0x3c2   :  { %763 = vmax.xlane.f32.xlu1 %v762_v32  ;;  %v783_v44 = vmax.f32 %v781_v45, %v782_v50  ;;  %v941_v56 = vsub.f32 %v3290_v33, %v940_v51  ;;  %v942_v57 = vsub.f32 %v3288_v13, %v940_v51 }
 0x3c3   :  { %760 = vmax.xlane.f32.xlu0 %v759_v49  ;;  %v1301_v58 = vrot.slane %v1300_v52, 2 }
 0x3c4   :  { %v784_v59 = vrot.slane %v783_v44, 2  ;;  %v3330_v60 = vpop.f32.mrb[6].mxu0  ;;  %v943_v61 = vmul.f32 1.442695, %v941_v56  ;;  %v945_v62 = vmul.f32 1.442695, %v942_v57 }
 0x3c5   :  { %v3332_v63 = vpop.f32.mrb[7].mxu0  ;;  %v3336_v1 = vsel %vm148_vm2, %v3330_v60, -inf  ;;  %v1302_v2 = vadd.f32 %v1301_v58, %v1300_v52 }
 0x3c6   :  { %v785_v3 = vmax.f32 %v783_v44, %v784_v59  ;;  %2863 = vpow2.f32 %v943_v61  ;;  %v3340_v8 = vsel %vm148_vm2, %v3332_v63, -inf }
 0x3c7   :  { %2865 = vpow2.f32 %v945_v62  ;;  %v1087_v11 = vmax.f32 %v3340_v8, %v3336_v1  ;;  %v1303_v4 = vrot.slane %v1302_v2, 1 }
 0x3c8   :  { %v786_v12 = vrot.slane %v785_v3, 1 }
 0x3c9   :  { %v1088_v6 = vrot.slane %v1087_v11, 4  ;;  %v1304_v25 = vadd.f32 %v1303_v4, %v1302_v2 }
 0x3ca   :  { %v787_v10 = vmax.f32 %v785_v3, %v786_v12 }
 0x3cb   :  { %v1089_v27 = vmax.f32 %v1087_v11, %v1088_v6  ;;  %v3344_v14 = vmul.f32 %v2607_v36, %v1304_v25  ;;  %v3346_v15 = vmul.f32 %v1304_v25, %v1196_v5 }
 0x3cc   :  { %v788_v16 = vsub.f32 %v3312_v29, %v787_v10  ;;  %v789_v17 = vsub.f32 %v3305_v41, %v787_v10 }
 0x3cd   :  { %v1090_v19 = vrot.slane %v1089_v27, 2 }
 0x3ce   :  { %v790_v20 = vmul.f32 1.442695, %v788_v16  ;;  %v792_v21 = vmul.f32 1.442695, %v789_v17 }
 0x3cf   :  { %v1091_v22 = vmax.f32 %v1089_v27, %v1090_v19 }
 0x3d0   :  { %v2864_v23 = vpop.eup %2863  ;;  %2867 = vpow2.f32 %v790_v20 }
 0x3d1   :  { %v2866_v7 = vpop.eup %2865  ;;  %2869 = vpow2.f32 %v792_v21  ;;  %v947_v24 = vsel %vm148_vm2, %v2864_v23, 0.0  ;;  %v1092_v26 = vrot.slane %v1091_v22, 1 }
 0x3d2   :  { %v948_v35 = vsel %vm148_vm2, %v2866_v7, 0.0 }
 0x3d3   :  { %v949_v36 = vadd.f32 %v948_v35, %v947_v24  ;;  %v1093_v37 = vmax.f32 %v1091_v22, %v1092_v26 }
 0x3d5   :  { %v950_v5 = vrot.slane %v949_v36, 4  ;;  %v1094_v9 = vsub.f32 %v3332_v63, %v1093_v37  ;;  %v1095_v38 = vsub.f32 %v3330_v60, %v1093_v37 }
 0x3d7   :  { %v951_v39 = vadd.f32 %v950_v5, %v949_v36  ;;  %v1096_v40 = vmul.f32 1.442695, %v1094_v9  ;;  %v1098_v28 = vmul.f32 1.442695, %v1095_v38 }
 0x3d9   :  { %v952_v30 = vrot.slane %v951_v39, 2  ;;  %2871 = vpow2.f32 %v1096_v40 }
 0x3da   :  { %v2868_v32 = vpop.eup %2867  ;;  %2873 = vpow2.f32 %v1098_v28 }
 0x3db   :  { %v2870_v46 = vpop.eup %2869  ;;  %v794_v47 = vsel %vm148_vm2, %v2868_v32, 0.0  ;;  %v953_v48 = vadd.f32 %v952_v30, %v951_v39 }
 0x3dc   :  { %v795_v49 = vsel %vm148_vm2, %v2870_v46, 0.0 }
 0x3dd   :  { %v796_v54 = vadd.f32 %v795_v49, %v794_v47  ;;  %v954_v45 = vrot.slane %v953_v48, 1 }
 0x3df   :  { %v797_v55 = vrot.slane %v796_v54, 4  ;;  %v955_v53 = vadd.f32 %v954_v45, %v953_v48 }
 0x3e1   :  { %v798_v50 = vadd.f32 %v797_v55, %v796_v54  ;;  %2875 = vrcp.f32 %v955_v53 }
 0x3e3   :  { %v2872_v51 = vpop.eup %2871  ;;  %v799_v52 = vrot.slane %v798_v50, 2 }
 0x3e4   :  { %v2874_v44 = vpop.eup %2873  ;;  %v1100_v56 = vsel %vm148_vm2, %v2872_v51, 0.0 }
 0x3e5   :  { %v800_v57 = vadd.f32 %v799_v52, %v798_v50  ;;  %v1101_v58 = vsel %vm148_vm2, %v2874_v44, 0.0 }
 0x3e6   :  { %v1102_v59 = vadd.f32 %v1101_v58, %v1100_v56 }
 0x3e7   :  { %v801_v61 = vrot.slane %v800_v57, 1 }
 0x3e8   :  { %v1103_v62 = vrot.slane %v1102_v59, 4 }
 0x3e9   :  { %v802_v2 = vadd.f32 %v801_v61, %v800_v57 }
 0x3ea   :  { %v1104_v3 = vadd.f32 %v1103_v62, %v1102_v59 }
 0x3eb   :  { %v2876_v11 = vpop.eup %2875  ;;  %2877 = vrcp.f32 %v802_v2 }
 0x3ec   :  { %v957_v4 = vmul.f32 %v2876_v11, %v2864_v23  ;;  %v958_v12 = vmul.f32 %v2876_v11, %v2866_v7  ;;  %v1105_v6 = vrot.slane %v1104_v3, 2 }
 0x3ee   :  { %963 = vst.msk [vmem:[#allocation3 + $0x50] sm:$0xff] %vm148_vm2, %v957_v4  ;;  %964 = vst.msk [vmem:[#allocation3 + $0x58] sm:$0xff] %vm148_vm2, %v958_v12  ;;  %v1106_v25 = vadd.f32 %v1105_v6, %v1104_v3 }
 0x3f0   :  { %v1107_v10 = vrot.slane %v1106_v25, 1 }
 0x3f2   :  { %v1108_v27 = vadd.f32 %v1107_v10, %v1106_v25 }
 0x3f4   :  { %2879 = vrcp.f32 %v1108_v27 }
 0x3f5   :  { %v2878_v16 = vpop.eup %2877  ;;  %v2061_v55 = vld [vmem:[#allocation3 + $0x50] sm:$0xff]  ;;  %v2062_v53 = vld [vmem:[#allocation3 + $0x58] sm:$0xff] }
 0x3f6   :  { %v804_v17 = vmul.f32 %v2878_v16, %v2868_v32  ;;  %v805_v19 = vmul.f32 %v2878_v16, %v2870_v46  ;;  %v2763_v56 = vpack.c.bf16 %v2062_v53, %v2061_v55 }
 0x3f8   :  { %810 = vst.msk [vmem:[#allocation3 + $0x40] sm:$0xff] %vm148_vm2, %v804_v17  ;;  %811 = vst.msk [vmem:[#allocation3 + $0x48] sm:$0xff] %vm148_vm2, %v805_v19 }
 0x3fe   :  { %v2880_v20 = vpop.eup %2879 }
 0x3ff   :  { %v1847_v21 = vld [vmem:[#allocation3 + $0x40] sm:$0xff]  ;;  %v1848_v22 = vld [vmem:[#allocation3 + $0x48] sm:$0xff]  ;;  %v1110_v23 = vmul.f32 %v2880_v20, %v2872_v51  ;;  %v1111_v7 = vmul.f32 %v2880_v20, %v2874_v44 }
 0x400   :  { %v2755_v24 = vpack.c.bf16 %v1848_v22, %v1847_v21 }
 0x401   :  { %1116 = vst.msk [vmem:[#allocation3 + $0x60] sm:$0xff] %vm148_vm2, %v1110_v23  ;;  %1117 = vst.msk [vmem:[#allocation3 + $0x68] sm:$0xff] %vm148_vm2, %v1111_v7 }
 0x402   :  { %2756 = vmatprep.subr.bf16.mxu1 %v2755_v24 }
 0x44b   :  { %v623_v26 = vpop.xlane.xlu1 %622 }
 0x44c   :  { %2881 = vrcp.f32 %v623_v26  ;;  %v620_v35 = vpop.xlane.xlu0 %619 }
 0x44d   :  { %2883 = vrcp.f32 %v620_v35 }
 0x44f   :  { %v764_v36 = vpop.xlane.xlu1 %763 }
 0x450   :  { %v766_v37 = vsub.f32 %v3305_v41, %v764_v36  ;;  %v761_v5 = vpop.xlane.xlu0 %760 }
 0x451   :  { %v765_v9 = vsub.f32 %v3312_v29, %v761_v5 }
 0x452   :  { %v769_v38 = vmul.f32 1.442695, %v766_v37 }
 0x453   :  { %v767_v39 = vmul.f32 1.442695, %v765_v9  ;;  %v2275_v9 = vld [vmem:[#allocation3 + $0x60] sm:$0xff] }
 0x454   :  { %2885 = vpow2.f32 %v769_v38  ;;  %v2276_v38 = vld [vmem:[#allocation3 + $0x68] sm:$0xff] }
 0x455   :  { %2887 = vpow2.f32 %v767_v39 }
 0x456   :  { %v2882_v40 = vpop.eup %2881 }
 0x457   :  { %v2884_v28 = vpop.eup %2883  ;;  %v627_v30 = vmul.f32 %v2882_v40, %v3309_v43 }
 0x458   :  { %v626_v32 = vmul.f32 %v2884_v28, %v3319_v31 }
 0x459   :  { %655 = vst.msk [vmem:[#allocation2 + $0x38] sm:$0xff] %vm148_vm2, %v627_v30 }
 0x45a   :  { %654 = vst.msk [vmem:[#allocation2 + $0x30] sm:$0xff] %vm148_vm2, %v626_v32 }
 0x45e   :  { %v2886_v46 = vpop.eup %2885 }
 0x45f   :  { %v2888_v47 = vpop.eup %2887  ;;  %v774_v41 = vsel %vm148_vm2, %v2886_v46, 0.0 }
 0x460   :  { %775 = vadd.xlane.f32.xlu1 %v774_v41  ;;  %v771_v29 = vsel %vm148_vm2, %v2888_v47, 0.0  ;;  %v1551_v48 = vld [vmem:[#allocation2 + $0x38] sm:$0xff] }
 0x461   :  { %772 = vadd.xlane.f32.xlu0 %v771_v29  ;;  %v1550_v49 = vld [vmem:[#allocation2 + $0x30] sm:$0xff] }
 0x462   :  { %v2743_v54 = vpack.c.bf16 %v1551_v48, %v1550_v49 }
 0x464   :  { %916 = vmax.xlane.f32.xlu1 %v3294_v18  ;;  %2744 = vmatprep.subr.bf16.mxu0 %v2743_v54 }
 0x465   :  { %2746 = vmatpush3.bf16.msra.mxu0 %v2743_v54  ;;  %913 = vmax.xlane.f32.xlu0 %v3298_v34 }
 0x48c   :  { %v2621_v43 = vpop.f32.mrb[8].mxu0 }
 0x48d   :  { %v1410_v31 = vpop.f32.mrb[9].mxu0 }
 0x48e   :  { %2633 = vmatprep.mubr.msk.f32.mxu0 %vm148_vm2, %v1410_v31 }
 0x48f   :  { %2634 = vmatmul.mubr.msk.f32.vlgmr.msra.gmra.mrb[10].mxu0 %vm148_vm2, %v2621_v43 }
 0x490   :  { %v2628_v45 = vpop.f32.mrb[10].mxu1 }
 0x491   :  { %v1511_v50 = vsel %vm148_vm2, %v2628_v45, 0.0  ;;  %v1493_v51 = vpop.f32.mrb[11].mxu1  ;;  %v3377_v52 = vmul.f32 %v2628_v45, %v2621_v43 }
 0x492   :  { %v1510_v18 = vsel %vm148_vm2, %v1493_v51, 0.0  ;;  %2640 = vmatprep.mubr.msk.f32.mxu1 %vm148_vm2, %v1493_v51  ;;  %v3381_v44 = vmul.f32 %v1493_v51, %v1410_v31 }
 0x493   :  { %v1512_v34 = vadd.f32 %v1511_v50, %v1510_v18  ;;  %2641 = vmatmul.mubr.msk.f32.vlgmr.msra.gmra.mrb[12].mxu1 %vm148_vm2, %v2628_v45 }
 0x494   :  { %2758 = vmatpush3.bf16.msra.mxu1 %v2755_v24 }
 0x495   :  { %v1513_v57 = vrot.slane %v1512_v34, 4  ;;  %2764 = vmatprep.subr.bf16.mxu1 %v2763_v56 }
 0x497   :  { %v1514_v58 = vadd.f32 %v1513_v57, %v1512_v34 }
 0x499   :  { %v1515_v59 = vrot.slane %v1514_v58, 2 }
 0x49b   :  { %v1516_v61 = vadd.f32 %v1515_v59, %v1514_v58 }
 0x49d   :  { %v1517_v62 = vrot.slane %v1516_v61, 1 }
 0x49f   :  { %v1518_v2 = vadd.f32 %v1517_v62, %v1516_v61 }
 0x4a1   :  { %v3384_v3 = vmul.f32 %v2621_v43, %v1518_v2  ;;  %v3386_v11 = vmul.f32 %v1518_v2, %v1410_v31 }
 0x4ed   :  { %v776_v4 = vpop.xlane.xlu1 %775 }
 0x4ee   :  { %2889 = vrcp.f32 %v776_v4  ;;  %v773_v12 = vpop.xlane.xlu0 %772 }
 0x4ef   :  { %2891 = vrcp.f32 %v773_v12 }
 0x4f1   :  { %v917_v6 = vpop.xlane.xlu1 %916 }
 0x4f2   :  { %v919_v25 = vsub.f32 %v3288_v13, %v917_v6  ;;  %v914_v10 = vpop.xlane.xlu0 %913  ;;  %v1293_v6 = vsel %vm148_vm2, %v3307_v42, 0.0  ;;  %v1504_v42 = vsel %vm148_vm2, %v3381_v44, 0.0 }
 0x4f3   :  { %v918_v27 = vsub.f32 %v3290_v33, %v914_v10  ;;  %v1310_v10 = vsel %vm148_vm2, %v3344_v14, 0.0  ;;  %v1521_v14 = vsel %vm148_vm2, %v3386_v11, 0.0 }
 0x4f4   :  { %v922_v16 = vmul.f32 1.442695, %v919_v25  ;;  %v1290_v25 = vsel %vm148_vm2, %v3317_v0, 0.0  ;;  %v1524_v0 = vsel %vm148_vm2, %v3384_v3, 0.0 }
 0x4f5   :  { %v920_v17 = vmul.f32 1.442695, %v918_v27  ;;  %v1307_v27 = vsel %vm148_vm2, %v3346_v15, 0.0 }
 0x4f6   :  { %2893 = vpow2.f32 %v922_v16  ;;  %v1507_v16 = vsel %vm148_vm2, %v3377_v52, 0.0 }
 0x4f7   :  { %2895 = vpow2.f32 %v920_v17 }
 0x4f8   :  { %v2890_v19 = vpop.eup %2889 }
 0x4f9   :  { %v2892_v20 = vpop.eup %2891  ;;  %v780_v21 = vmul.f32 %v2890_v19, %v2886_v46 }
 0x4fa   :  { %v779_v22 = vmul.f32 %v2892_v20, %v2888_v47 }
 0x4fb   :  { %808 = vst.msk [vmem:[#allocation2 + $0x48] sm:$0xff] %vm148_vm2, %v780_v21 }
 0x4fc   :  { %807 = vst.msk [vmem:[#allocation2 + $0x40] sm:$0xff] %vm148_vm2, %v779_v22 }
 0x500   :  { %v2894_v23 = vpop.eup %2893 }
 0x501   :  { %v2896_v7 = vpop.eup %2895  ;;  %v927_v24 = vsel %vm148_vm2, %v2894_v23, 0.0 }
 0x502   :  { %928 = vadd.xlane.f32.xlu1 %v927_v24  ;;  %v924_v13 = vsel %vm148_vm2, %v2896_v7, 0.0  ;;  %v1765_v33 = vld [vmem:[#allocation2 + $0x48] sm:$0xff] }
 0x503   :  { %925 = vadd.xlane.f32.xlu0 %v924_v13  ;;  %v1764_v26 = vld [vmem:[#allocation2 + $0x40] sm:$0xff] }
 0x504   :  { %v2751_v35 = vpack.c.bf16 %v1765_v33, %v1764_v26 }
 0x506   :  { %1069 = vmax.xlane.f32.xlu1 %v3336_v1  ;;  %2752 = vmatprep.subr.bf16.mxu0 %v2751_v35 }
 0x507   :  { %2754 = vmatpush3.bf16.msra.mxu0 %v2751_v35  ;;  %1066 = vmax.xlane.f32.xlu0 %v3340_v8  ;;  %v3402_v8 = vpack.c.bf16 %v2276_v38, %v2275_v9 }
 0x562   :  { %v2635_v36 = vpop.f32.mrb[10].mxu0 }
 0x563   :  { %v1624_v37 = vpop.f32.mrb[11].mxu0 }
 0x564   :  { %2647 = vmatprep.mubr.msk.f32.mxu0 %vm148_vm2, %v1624_v37 }
 0x565   :  { %2648 = vmatmul.mubr.msk.f32.vlgmr.msra.gmra.mrb[12].mxu0 %vm148_vm2, %v2635_v36 }
 0x566   :  { %v2642_v5 = vpop.f32.mrb[12].mxu1 }
 0x567   :  { %v1725_v39 = vsel %vm148_vm2, %v2642_v5, 0.0  ;;  %v1707_v40 = vpop.f32.mrb[13].mxu1  ;;  %v1717_v28 = vmul.f32 %v2642_v5, %v2635_v36 }
 0x568   :  { %v1724_v30 = vsel %vm148_vm2, %v1707_v40, 0.0  ;;  %2654 = vmatprep.mubr.msk.f32.mxu1 %vm148_vm2, %v1707_v40  ;;  %v1716_v1 = vmul.f32 %v1707_v40, %v1624_v37 }
 0x569   :  { %v1726_v32 = vadd.f32 %v1725_v39, %v1724_v30  ;;  %2655 = vmatmul.mubr.msk.f32.vlgmr.msra.gmra.mrb[14].mxu1 %vm148_vm2, %v2642_v5  ;;  %v1721_v17 = vsel %vm148_vm2, %v1717_v28, 0.0 }
 0x56a   :  { %2766 = vmatpush3.bf16.msra.mxu1 %v2763_v56  ;;  %v1718_v15 = vsel %vm148_vm2, %v1716_v1, 0.0 }
 0x56b   :  { %v1727_v46 = vrot.slane %v1726_v32, 4  ;;  %2772 = vmatprep.subr.bf16.mxu1 %v3402_v8 }
 0x56d   :  { %v1728_v47 = vadd.f32 %v1727_v46, %v1726_v32 }
 0x56f   :  { %v1729_v41 = vrot.slane %v1728_v47, 2 }
 0x571   :  { %v1730_v29 = vadd.f32 %v1729_v41, %v1728_v47 }
 0x573   :  { %v1731_v48 = vrot.slane %v1730_v29, 1 }
 0x575   :  { %v1732_v49 = vadd.f32 %v1731_v48, %v1730_v29 }
 0x577   :  { %v1734_v54 = vmul.f32 %v2635_v36, %v1732_v49  ;;  %v1733_v43 = vmul.f32 %v1732_v49, %v1624_v37 }
 0x579   :  { %v1738_v52 = vsel %vm148_vm2, %v1734_v54, 0.0  ;;  %v1735_v44 = vsel %vm148_vm2, %v1733_v43, 0.0 }
 0x58f   :  { %v929_v31 = vpop.xlane.xlu1 %928 }
 0x590   :  { %2897 = vrcp.f32 %v929_v31  ;;  %v926_v45 = vpop.xlane.xlu0 %925 }
 0x591   :  { %2899 = vrcp.f32 %v926_v45 }
 0x593   :  { %v1070_v55 = vpop.xlane.xlu1 %1069 }
 0x594   :  { %v1072_v53 = vsub.f32 %v3330_v60, %v1070_v55  ;;  %v1067_v50 = vpop.xlane.xlu0 %1066 }
 0x595   :  { %v1071_v51 = vsub.f32 %v3332_v63, %v1067_v50 }
 0x596   :  { %v1075_v18 = vmul.f32 1.442695, %v1072_v53 }
 0x597   :  { %v1073_v34 = vmul.f32 1.442695, %v1071_v51 }
 0x598   :  { %2901 = vpow2.f32 %v1075_v18 }
 0x599   :  { %2903 = vpow2.f32 %v1073_v34 }
 0x59a   :  { %v2898_v56 = vpop.eup %2897 }
 0x59b   :  { %v2900_v57 = vpop.eup %2899  ;;  %v933_v58 = vmul.f32 %v2898_v56, %v2894_v23 }
 0x59c   :  { %v932_v59 = vmul.f32 %v2900_v57, %v2896_v7 }
 0x59d   :  { %961 = vst.msk [vmem:[#allocation2 + $0x58] sm:$0xff] %vm148_vm2, %v933_v58 }
 0x59e   :  { %960 = vst.msk [vmem:[#allocation2 + $0x50] sm:$0xff] %vm148_vm2, %v932_v59 }
 0x5a2   :  { %v2902_v61 = vpop.eup %2901 }
 0x5a3   :  { %v2904_v62 = vpop.eup %2903  ;;  %v1080_v2 = vsel %vm148_vm2, %v2902_v61, 0.0 }
 0x5a4   :  { %1081 = vadd.xlane.f32.xlu1 %v1080_v2  ;;  %v1077_v60 = vsel %vm148_vm2, %v2904_v62, 0.0  ;;  %v1979_v63 = vld [vmem:[#allocation2 + $0x58] sm:$0xff] }
 0x5a5   :  { %1078 = vadd.xlane.f32.xlu0 %v1077_v60  ;;  %v1978_v4 = vld [vmem:[#allocation2 + $0x50] sm:$0xff] }
 0x5a6   :  { %v2759_v12 = vpack.c.bf16 %v1979_v63, %v1978_v4 }
 0x5a8   :  { %1294 = vadd.xlane.f32.xlu1 %v1293_v6  ;;  %2760 = vmatprep.subr.bf16.mxu0 %v2759_v12 }
 0x5a9   :  { %2762 = vmatpush3.bf16.msra.mxu0 %v2759_v12  ;;  %1291 = vadd.xlane.f32.xlu0 %v1290_v25 }
 0x5ac   :  { %1311 = vadd.xlane.f32.xlu1 %v1310_v10 }
 0x5ad   :  { %1308 = vadd.xlane.f32.xlu0 %v1307_v27 }
 0x5b0   :  { %1508 = vadd.xlane.f32.xlu1 %v1507_v16 }
 0x5b1   :  { %1505 = vadd.xlane.f32.xlu0 %v1504_v42 }
 0x5b4   :  { %1525 = vadd.xlane.f32.xlu1 %v1524_v0 }
 0x5b5   :  { %1522 = vadd.xlane.f32.xlu0 %v1521_v14 }
 0x5b8   :  { %1722 = vadd.xlane.f32.xlu1 %v1721_v17 }
 0x5b9   :  { %1719 = vadd.xlane.f32.xlu0 %v1718_v15 }
 0x5bc   :  { %1739 = vadd.xlane.f32.xlu1 %v1738_v52 }
 0x5bd   :  { %1736 = vadd.xlane.f32.xlu0 %v1735_v44 }
 0x631   :  { %v1082_v19 = vpop.xlane.xlu1 %1081 }
 0x632   :  { %2905 = vrcp.f32 %v1082_v19  ;;  %v1079_v3 = vpop.xlane.xlu0 %1078 }
 0x633   :  { %2907 = vrcp.f32 %v1079_v3 }
 0x638   :  { %v2649_v20 = vpop.f32.mrb[12].mxu0 }
 0x639   :  { %v1838_v21 = vpop.f32.mrb[13].mxu0 }
 0x63a   :  { %2661 = vmatprep.mubr.msk.f32.mxu0 %vm148_vm2, %v1838_v21 }
 0x63b   :  { %2662 = vmatmul.mubr.msk.f32.vlgmr.msra.gmra.mrb[14].mxu0 %vm148_vm2, %v2649_v20 }
 0x63c   :  { %v2906_v11 = vpop.eup %2905  ;;  %v2656_v22 = vpop.f32.mrb[14].mxu1 }
 0x63d   :  { %v2908_v23 = vpop.eup %2907  ;;  %v1086_v7 = vmul.f32 %v2906_v11, %v2902_v61  ;;  %v1939_v24 = vsel %vm148_vm2, %v2656_v22, 0.0  ;;  %v1921_v13 = vpop.f32.mrb[15].mxu1  ;;  %v1931_v33 = vmul.f32 %v2656_v22, %v2649_v20 }
 0x63e   :  { %v1085_v26 = vmul.f32 %v2908_v23, %v2904_v62  ;;  %v1938_v35 = vsel %vm148_vm2, %v1921_v13, 0.0  ;;  %2668 = vmatprep.mubr.msk.f32.mxu1 %vm148_vm2, %v1921_v13  ;;  %v1930_v36 = vmul.f32 %v1921_v13, %v1838_v21  ;;  %v1292_v13 = vpop.xlane.xlu0 %1291 }
 0x63f   :  { %1114 = vst.msk [vmem:[#allocation2 + $0x68] sm:$0xff] %vm148_vm2, %v1086_v7  ;;  %v1940_v37 = vadd.f32 %v1939_v24, %v1938_v35  ;;  %2669 = vmatmul.mubr.msk.f32.vlgmr.msra.gmra.mrb[16].mxu1 %vm148_vm2, %v2656_v22  ;;  %v1935_v5 = vsel %vm148_vm2, %v1931_v33, 0.0  ;;  %v1295_v24 = vpop.xlane.xlu1 %1294 }
 0x640   :  { %1113 = vst.msk [vmem:[#allocation2 + $0x60] sm:$0xff] %vm148_vm2, %v1085_v26  ;;  %2774 = vmatpush3.bf16.msra.mxu1 %v3402_v8  ;;  %1936 = vadd.xlane.f32.xlu1 %v1935_v5  ;;  %v1932_v9 = vsel %vm148_vm2, %v1930_v36, 0.0 }
 0x641   :  { %v1941_v38 = vrot.slane %v1940_v37, 4  ;;  %1933 = vadd.xlane.f32.xlu0 %v1932_v9 }
 0x642   :  { %v1309_v26 = vpop.xlane.xlu0 %1308 }
 0x643   :  { %v1942_v39 = vadd.f32 %v1941_v38, %v1940_v37  ;;  %v1312_v33 = vpop.xlane.xlu1 %1311 }
 0x645   :  { %v1943_v40 = vrot.slane %v1942_v39, 2 }
 0x646   :  { %v2193_v28 = vld [vmem:[#allocation2 + $0x68] sm:$0xff]  ;;  %v1506_v36 = vpop.xlane.xlu0 %1505 }
 0x647   :  { %v2192_v30 = vld [vmem:[#allocation2 + $0x60] sm:$0xff]  ;;  %v1944_v1 = vadd.f32 %v1943_v40, %v1942_v39  ;;  %v1509_v35 = vpop.xlane.xlu1 %1508 }
 0x648   :  { %v2767_v32 = vpack.c.bf16 %v2193_v28, %v2192_v30  ;;  %v1320_v28 = vadd.f32 1e-20, %v1295_v24  ;;  %v1319_v30 = vadd.f32 1e-20, %v1292_v13 }
 0x649   :  { %v1945_v46 = vrot.slane %v1944_v1, 1 }
 0x64a   :  { %2768 = vmatprep.subr.bf16.mxu0 %v2767_v32  ;;  %v1523_v5 = vpop.xlane.xlu0 %1522  ;;  %2909 = vlog2.f32 %v1320_v28 }
 0x64b   :  { %2770 = vmatpush3.bf16.msra.mxu0 %v2767_v32  ;;  %v1946_v47 = vadd.f32 %v1945_v46, %v1944_v1  ;;  %v1526_v37 = vpop.xlane.xlu1 %1525  ;;  %v1314_v32 = vadd.f32 1.6e-19, %v1312_v33  ;;  %2911 = vlog2.f32 %v1319_v30 }
 0x64d   :  { %v1948_v41 = vmul.f32 %v2649_v20, %v1946_v47  ;;  %v1947_v29 = vmul.f32 %v1946_v47, %v1838_v21  ;;  %v1313_v47 = vadd.f32 1.6e-19, %v1309_v26  ;;  %2913 = vlog2.f32 %v1314_v32 }
 0x64e   :  { %v1720_v38 = vpop.xlane.xlu0 %1719 }
 0x64f   :  { %v1952_v48 = vsel %vm148_vm2, %v1948_v41, 0.0  ;;  %v1949_v8 = vsel %vm148_vm2, %v1947_v29, 0.0  ;;  %v1723_v9 = vpop.xlane.xlu1 %1722  ;;  %v1534_v41 = vadd.f32 1e-20, %v1509_v35  ;;  %v1533_v29 = vadd.f32 1e-20, %v1506_v36 }
 0x650   :  { %1953 = vadd.xlane.f32.xlu1 %v1952_v48  ;;  %1950 = vadd.xlane.f32.xlu0 %v1949_v8  ;;  %v1528_v8 = vadd.f32 1.6e-19, %v1526_v37  ;;  %2915 = vlog2.f32 %v1313_v47 }
 0x651   :  { %2917 = vlog2.f32 %v1534_v41 }
 0x652   :  { %v1737_v40 = vpop.xlane.xlu0 %1736  ;;  %2919 = vlog2.f32 %v1533_v29 }
 0x653   :  { %v1740_v39 = vpop.xlane.xlu1 %1739  ;;  %2921 = vlog2.f32 %v1528_v8 }
 0x6cd   :  { %v1937_v1 = vpop.xlane.xlu1 %1936 }
 0x6ce   :  { %v1934_v46 = vpop.xlane.xlu0 %1933 }
 0x6dd   :  { %v1954_v48 = vpop.xlane.xlu1 %1953 }
 0x70e   :  { %v2663_v49 = vpop.f32.mrb[14].mxu0 }
 0x70f   :  { %v2052_v54 = vpop.f32.mrb[15].mxu0 }
 0x710   :  { %2675 = vmatprep.mubr.msk.f32.mxu0 %vm148_vm2, %v2052_v54 }
 0x711   :  { %2676 = vmatmul.mubr.msk.f32.vlgmr.msra.gmra.mrb[16].mxu0 %vm148_vm2, %v2663_v49 }
 0x712   :  { %v2670_v43 = vpop.f32.mrb[16].mxu1 }
 0x713   :  { %v2153_v31 = vsel %vm148_vm2, %v2670_v43, 0.0  ;;  %v2135_v45 = vpop.f32.mrb[17].mxu1  ;;  %v2145_v55 = vmul.f32 %v2670_v43, %v2663_v49 }
 0x714   :  { %v2152_v53 = vsel %vm148_vm2, %v2135_v45, 0.0  ;;  %2682 = vmatprep.mubr.msk.f32.mxu1 %vm148_vm2, %v2135_v45  ;;  %v2144_v50 = vmul.f32 %v2135_v45, %v2052_v54 }
 0x715   :  { %v2154_v51 = vadd.f32 %v2153_v31, %v2152_v53  ;;  %2683 = vmatmul.mubr.msk.f32.vlgmr.msra.gmra.mrb[18].mxu1 %vm148_vm2, %v2670_v43  ;;  %v2149_v18 = vsel %vm148_vm2, %v2145_v55, 0.0  ;;  %v1748_v43 = vadd.f32 1e-20, %v1723_v9  ;;  %v1747_v31 = vadd.f32 1e-20, %v1720_v38 }
 0x716   :  { %2150 = vadd.xlane.f32.xlu1 %v2149_v18  ;;  %v2146_v34 = vsel %vm148_vm2, %v2144_v50, 0.0  ;;  %v1742_v55 = vadd.f32 1.6e-19, %v1740_v39  ;;  %v1741_v50 = vadd.f32 1.6e-19, %v1737_v40 }
 0x717   :  { %v2155_v56 = vrot.slane %v2154_v51, 4  ;;  %2147 = vadd.xlane.f32.xlu0 %v2146_v34  ;;  %v1961_v18 = vadd.f32 1e-20, %v1934_v46 }
 0x719   :  { %v2156_v57 = vadd.f32 %v2155_v56, %v2154_v51  ;;  %v1962_v51 = vadd.f32 1e-20, %v1937_v1  ;;  %v2910_v56 = vpop.eup %2909 }
 0x71a   :  { %v1324_v13 = vmul.f32 0.6931472, %v2910_v56 }
 0x71b   :  { %v2157_v58 = vrot.slane %v2156_v57, 2 }
 0x71d   :  { %v2158_v59 = vadd.f32 %v2157_v58, %v2156_v57  ;;  %v1956_v57 = vadd.f32 1.6e-19, %v1954_v48 }
 0x71f   :  { %v2159_v61 = vrot.slane %v2158_v59, 1 }
 0x721   :  { %v2160_v62 = vadd.f32 %v2159_v61, %v2158_v59  ;;  %v2912_v59 = vpop.eup %2911 }
 0x722   :  { %v1322_v33 = vmul.f32 0.6931472, %v2912_v59 }
 0x723   :  { %v2162_v2 = vmul.f32 %v2663_v49, %v2160_v62  ;;  %v2161_v60 = vmul.f32 %v2160_v62, %v2052_v54  ;;  %v1951_v49 = vpop.xlane.xlu0 %1950  ;;  %v1527_v54 = vadd.f32 1.6e-19, %v1523_v5  ;;  %v2914_v62 = vpop.eup %2913 }
 0x724   :  { %v1955_v61 = vadd.f32 1.6e-19, %v1951_v49 }
 0x725   :  { %v2166_v63 = vsel %vm148_vm2, %v2162_v2, 0.0  ;;  %v2163_v4 = vsel %vm148_vm2, %v2161_v60, 0.0  ;;  %2923 = vlog2.f32 %v1527_v54  ;;  %v2916_v60 = vpop.eup %2915 }
 0x726   :  { %2167 = vadd.xlane.f32.xlu1 %v2166_v63  ;;  %2164 = vadd.xlane.f32.xlu0 %v2163_v4  ;;  %2925 = vlog2.f32 %v1748_v43  ;;  %v2918_v4 = vpop.eup %2917 }
 0x727   :  { %2927 = vlog2.f32 %v1747_v31 }
 0x728   :  { %2929 = vlog2.f32 %v1742_v55 }
 0x729   :  { %2931 = vlog2.f32 %v1741_v50 }
 0x72a   :  { %2933 = vlog2.f32 %v1962_v51 }
 0x72b   :  { %2935 = vlog2.f32 %v1961_v18 }
 0x72c   :  { %2937 = vlog2.f32 %v1956_v57 }
 0x72d   :  { %2939 = vlog2.f32 %v1955_v61 }
 0x7a3   :  { %v2151_v45 = vpop.xlane.xlu1 %2150 }
 0x7a4   :  { %v2148_v53 = vpop.xlane.xlu0 %2147 }
 0x7b3   :  { %v2168_v34 = vpop.xlane.xlu1 %2167  ;;  %v2165_v58 = vpop.xlane.xlu0 %2164 }
 0x7b4   :  { %v2170_v2 = vadd.f32 1.6e-19, %v2168_v34  ;;  %v2169_v63 = vadd.f32 1.6e-19, %v2165_v58 }
 0x7b6   :  { %2941 = vlog2.f32 %v2170_v2 }
 0x7b7   :  { %2943 = vlog2.f32 %v2169_v63 }
 0x7e4   :  { %v2677_v12 = vpop.f32.mrb[16].mxu0 }
 0x7e5   :  { %v2266_v6 = vpop.f32.mrb[17].mxu0 }
 0x7e8   :  { %v2684_v25 = vpop.f32.mrb[18].mxu1 }
 0x7e9   :  { %v2359_v10 = vmul.f32 %v2684_v25, %v2677_v12  ;;  %v2367_v27 = vsel %vm148_vm2, %v2684_v25, 0.0  ;;  %v2349_v16 = vpop.f32.mrb[19].mxu1  ;;  %v2175_v25 = vadd.f32 1e-20, %v2148_v53 }
 0x7ea   :  { %v2358_v42 = vmul.f32 %v2349_v16, %v2266_v6  ;;  %v2366_v0 = vsel %vm148_vm2, %v2349_v16, 0.0 }
 0x7eb   :  { %v2368_v14 = vadd.f32 %v2367_v27, %v2366_v0  ;;  %v2363_v17 = vsel %vm148_vm2, %v2359_v10, 0.0 }
 0x7ec   :  { %2364 = vadd.xlane.f32.xlu1 %v2363_v17  ;;  %v2360_v15 = vsel %vm148_vm2, %v2358_v42, 0.0 }
 0x7ed   :  { %v2369_v52 = vrot.slane %v2368_v14, 4  ;;  %2361 = vadd.xlane.f32.xlu0 %v2360_v15 }
 0x7ef   :  { %v2370_v44 = vadd.f32 %v2369_v52, %v2368_v14 }
 0x7f1   :  { %v2371_v19 = vrot.slane %v2370_v44, 2 }
 0x7f3   :  { %v2372_v3 = vadd.f32 %v2371_v19, %v2370_v44 }
 0x7f5   :  { %v2373_v20 = vrot.slane %v2372_v3, 1 }
 0x7f7   :  { %v2374_v21 = vadd.f32 %v2373_v20, %v2372_v3  ;;  %v1318_v3 = vmul.f32 0.6931472, %v2914_v62  ;;  %v1316_v20 = vmul.f32 0.6931472, %v2916_v60 }
 0x7f9   :  { %v2376_v11 = vmul.f32 %v2677_v12, %v2374_v21  ;;  %v2375_v22 = vmul.f32 %v2374_v21, %v2266_v6  ;;  %v2176_v12 = vadd.f32 1e-20, %v2151_v45  ;;  %v2920_v6 = vpop.eup %2919  ;;  %v1538_v21 = vmul.f32 0.6931472, %v2918_v4 }
 0x7fa   :  { %v2922_v10 = vpop.eup %2921  ;;  %v1326_v38 = vsub.f32 %v1318_v3, %v1324_v13  ;;  %v1325_v30 = vsub.f32 %v1316_v20, %v1322_v33 }
 0x7fb   :  { %v2380_v23 = vsel %vm148_vm2, %v2376_v11, 0.0  ;;  %v2377_v7 = vsel %vm148_vm2, %v2375_v22, 0.0  ;;  %v2924_v27 = vpop.eup %2923  ;;  %2945 = vlog2.f32 %v2176_v12  ;;  %v1532_v52 = vmul.f32 0.6931472, %v2922_v10 }
 0x7fc   :  { %2381 = vadd.xlane.f32.xlu1 %v2380_v23  ;;  %2378 = vadd.xlane.f32.xlu0 %v2377_v7  ;;  %v2926_v16 = vpop.eup %2925  ;;  %2947 = vlog2.f32 %v2175_v25  ;;  %v1530_v44 = vmul.f32 0.6931472, %v2924_v27  ;;  %v1536_v22 = vmul.f32 0.6931472, %v2920_v6  ;;  %v1327_v55 = vadd.f32 %v1326_v38, %v1325_v30 }
 0x7fd   :  { %v2928_v42 = vpop.eup %2927  ;;  %v1540_v35 = vsub.f32 %v1532_v52, %v1538_v21  ;;  %v1752_v37 = vmul.f32 0.6931472, %v2926_v16 }
 0x7fe   :  { %v2930_v0 = vpop.eup %2929  ;;  %v1539_v36 = vsub.f32 %v1530_v44, %v1536_v22  ;;  %v1750_v5 = vmul.f32 0.6931472, %v2928_v42  ;;  %v1328_v58 = vrot.slane %v1327_v55, 4 }
 0x7ff   :  { %v2932_v14 = vpop.eup %2931  ;;  %v1746_v23 = vmul.f32 0.6931472, %v2930_v0 }
 0x800   :  { %v2934_v17 = vpop.eup %2933  ;;  %v1744_v7 = vmul.f32 0.6931472, %v2932_v14  ;;  %v1541_v48 = vadd.f32 %v1540_v35, %v1539_v36  ;;  %v1329_v6 = vadd.f32 %v1328_v58, %v1327_v55 }
 0x801   :  { %v2936_v15 = vpop.eup %2935  ;;  %v1754_v1 = vsub.f32 %v1746_v23, %v1752_v37  ;;  %v1966_v46 = vmul.f32 0.6931472, %v2934_v17 }
 0x802   :  { %v2938_v19 = vpop.eup %2937  ;;  %v1753_v32 = vsub.f32 %v1744_v7, %v1750_v5  ;;  %v1964_v47 = vmul.f32 0.6931472, %v2936_v15  ;;  %v1542_v56 = vrot.slane %v1541_v48, 4  ;;  %v1330_v42 = vrot.slane %v1329_v6, 2 }
 0x803   :  { %v2940_v11 = vpop.eup %2939  ;;  %v1960_v39 = vmul.f32 0.6931472, %v2938_v19 }
 0x804   :  { %v2942_v24 = vpop.eup %2941  ;;  %v1958_v40 = vmul.f32 0.6931472, %v2940_v11  ;;  %v1755_v53 = vadd.f32 %v1754_v1, %v1753_v32  ;;  %v1543_v4 = vadd.f32 %v1542_v56, %v1541_v48  ;;  %v1331_v3 = vadd.f32 %v1330_v42, %v1329_v6 }
 0x805   :  { %v2944_v26 = vpop.eup %2943  ;;  %v2174_v41 = vmul.f32 0.6931472, %v2942_v24  ;;  %v1968_v49 = vsub.f32 %v1960_v39, %v1966_v46 }
 0x806   :  { %v2946_v9 = vpop.eup %2945  ;;  %v2172_v29 = vmul.f32 0.6931472, %v2944_v26  ;;  %v1967_v54 = vsub.f32 %v1958_v40, %v1964_v47  ;;  %v1756_v59 = vrot.slane %v1755_v53, 4  ;;  %v1544_v27 = vrot.slane %v1543_v4, 2 }
 0x807   :  { %v2948_v28 = vpop.eup %2947  ;;  %v2180_v43 = vmul.f32 0.6931472, %v2946_v9  ;;  %v1332_v35 = vrot.slane %v1331_v3, 1 }
 0x808   :  { %v2178_v31 = vmul.f32 0.6931472, %v2948_v28  ;;  %v1969_v57 = vadd.f32 %v1968_v49, %v1967_v54  ;;  %v1757_v25 = vadd.f32 %v1756_v59, %v1755_v53  ;;  %v1545_v15 = vadd.f32 %v1544_v27, %v1543_v4 }
 0x809   :  { %v2182_v50 = vsub.f32 %v2174_v41, %v2180_v43  ;;  %v1333_v40 = vadd.f32 %v1332_v35, %v1331_v3 }
 0x80a   :  { %v2181_v51 = vsub.f32 %v2172_v29, %v2178_v31  ;;  %v1970_v12 = vrot.slane %v1969_v57, 4  ;;  %v1758_v0 = vrot.slane %v1757_v25, 2  ;;  %v1546_v7 = vrot.slane %v1545_v15, 1 }
 0x80b   :  { %v1334_v41 = vmul.f32 0.0625, %v1333_v40 }
 0x80c   :  { %v2183_v2 = vadd.f32 %v2182_v50, %v2181_v51  ;;  %v1971_v16 = vadd.f32 %v1970_v12, %v1969_v57  ;;  %v1759_v20 = vadd.f32 %v1758_v0, %v1757_v25  ;;  %v1547_v9 = vadd.f32 %v1546_v7, %v1545_v15 }
 0x80e   :  { %v2184_v10 = vrot.slane %v2183_v2, 4  ;;  %v1972_v52 = vrot.slane %v1971_v16, 2  ;;  %v1760_v36 = vrot.slane %v1759_v20, 1  ;;  %v1548_v32 = vmul.f32 0.0625, %v1547_v9 }
 0x810   :  { %v2185_v14 = vadd.f32 %v2184_v10, %v2183_v2  ;;  %v1973_v24 = vadd.f32 %v1972_v52, %v1971_v16  ;;  %v1761_v28 = vadd.f32 %v1760_v36, %v1759_v20  ;;  %v1549_v54 = vadd.f32 %v1548_v32, %v1334_v41 }
 0x812   :  { %v2186_v21 = vrot.slane %v2185_v14, 2  ;;  %v1974_v38 = vrot.slane %v1973_v24, 1  ;;  %v1762_v29 = vmul.f32 0.0625, %v1761_v28 }
 0x814   :  { %v2187_v37 = vadd.f32 %v2186_v21, %v2185_v14  ;;  %v1975_v47 = vadd.f32 %v1974_v38, %v1973_v24  ;;  %v1763_v31 = vadd.f32 %v1762_v29, %v1549_v54 }
 0x816   :  { %v2188_v1 = vrot.slane %v2187_v37, 1  ;;  %v1976_v43 = vmul.f32 0.0625, %v1975_v47 }
 0x818   :  { %v1977_v53 = vadd.f32 %v1976_v43, %v1763_v31 }
 0x879   :  { %v2365_v8 = vpop.xlane.xlu1 %2364 }
 0x87a   :  { %v2362_v45 = vpop.xlane.xlu0 %2361  ;;  %v2390_v18 = vadd.f32 1e-20, %v2365_v8  ;;  %v2189_v8 = vadd.f32 %v2188_v1, %v2187_v37 }
 0x87b   :  { %v2389_v34 = vadd.f32 1e-20, %v2362_v45 }
 0x87c   :  { %2949 = vlog2.f32 %v2390_v18  ;;  %v2190_v45 = vmul.f32 0.0625, %v2189_v8 }
 0x87d   :  { %2951 = vlog2.f32 %v2389_v34 }
 0x87e   :  { %v2191_v51 = vadd.f32 %v2190_v45, %v1977_v53 }
 0x886   :  { %v2950_v17 = vpop.eup %2949 }
 0x887   :  { %v2952_v44 = vpop.eup %2951  ;;  %v2394_v22 = vmul.f32 0.6931472, %v2950_v17 }
 0x888   :  { %v2392_v13 = vmul.f32 0.6931472, %v2952_v44 }
 0x889   :  { %v2382_v61 = vpop.xlane.xlu1 %2381  ;;  %v2379_v62 = vpop.xlane.xlu0 %2378 }
 0x88a   :  { %v2384_v60 = vadd.f32 1.6e-19, %v2382_v61  ;;  %v2383_v63 = vadd.f32 1.6e-19, %v2379_v62 }
 0x88c   :  { %2953 = vlog2.f32 %v2384_v60 }
 0x88d   :  { %2955 = vlog2.f32 %v2383_v63 }
 0x896   :  { %v2954_v19 = vpop.eup %2953 }
 0x897   :  { %v2956_v11 = vpop.eup %2955  ;;  %v2388_v23 = vmul.f32 0.6931472, %v2954_v19 }
 0x898   :  { %v2386_v33 = vmul.f32 0.6931472, %v2956_v11 }
 0x899   :  { %v2396_v26 = vsub.f32 %v2388_v23, %v2394_v22 }
 0x89a   :  { %v2395_v5 = vsub.f32 %v2386_v33, %v2392_v13 }
 0x89c   :  { %v2397_v39 = vadd.f32 %v2396_v26, %v2395_v5 }
 0x89e   :  { %v2398_v30 = vrot.slane %v2397_v39, 4 }
 0x8a0   :  { %v2399_v46 = vadd.f32 %v2398_v30, %v2397_v39 }
 0x8a2   :  { %v2400_v48 = vrot.slane %v2399_v46, 2 }
 0x8a4   :  { %v2401_v49 = vadd.f32 %v2400_v48, %v2399_v46 }
 0x8a6   :  { %v2402_v55 = vrot.slane %v2401_v49, 1 }
 0x8a8   :  { %v2403_v50 = vadd.f32 %v2402_v55, %v2401_v49 }
 0x8aa   :  { %v2404_v18 = vmul.f32 0.0625, %v2403_v50 }
 0x8ac   :  { %v2405_v34 = vadd.f32 %v2404_v18, %v2191_v51 }
 0x8ae   :  { %v2406_v56 = vmul.f32 0.16666667, %v2405_v34 }
 0x8b0   :  { %2408 = vst.msk [vmem:[#allocation7] sm:$0x1] %vm2407_vm3, %v2406_v56 }
 0x8b1   :  { %2990 = shalt.err (!%p2987_p12)
}
 0x8b2   :  { %s2991_s25 = scalar_lea.hbm %s3473_s1, 16 }
 0x8b3   :  { %p2992_p13 = scmp.ne.s32.totalorder %s3473_s1, %s2991_s25  ;;  %p2995_p0 = scmp.lt.u32.totalorder %s2991_s25, %s3473_s1 }
 0x8b5   :  { %p2997_p1 = pnand %p2995_p0, %p2992_p13 }
 0x8b7   :  { %3000 = shalt.err (!%p2997_p1)
}
 0x8b8   :  { %2418 = dma.vmem_to_hbm [thread:$0]  %s2416_s20, 16, %s3473_s1, [#allocation6]  }
 0x8b9   :  { %3003 = dma.done.wait [#allocation6], 16  }
 0x8ba   :  { %3004 = vsyncadd [#allocation6], 4294967280 }
 0x8bb   :  { %2422 = vsyncpa [#allocation5], 1 }
 0x8bc   :  { %2423 = vsyncpa [#allocation6], 1 }

</bundles_post_ra>
